<compile_context>
chip_gen: v5e
topology: v5e:2x2
jax: 0.10.0
libtpu: 0.0.40
codegen_flags: <defaults>
</compile_context>

<pallas_src>
import jax
import jax.numpy as jnp
from jax.experimental import pallas as pl
from jax.experimental.pallas import tpu as pltpu

# --- tiny ViT config (prov-gigapath is ViT-giant: patch16 / 1536d / 40L / 24H;
#     scaled down here to img=16, patch=8, D=128, 2 layers, 2 heads) ---
IMG = 16
PATCH = 8
IN_CH = 3
EMBED = 128
DEPTH = 2
HEADS = 2
HEAD_DIM = EMBED // HEADS
MLP_HID = 4 * EMBED
NUM_PATCHES = (IMG // PATCH) ** 2       # 4
SEQ = NUM_PATCHES + 1                   # 5 (cls + patches)
SEQ_PAD = 8                             # padded to a sublane multiple
PATCH_DIM = IN_CH * PATCH * PATCH       # 192
EPS = 1e-6
B_TILE = 4                              # images per grid step


# -------------------------- in-kernel helpers --------------------------------

def _layernorm(x, g, b):
    mu = jnp.mean(x, axis=-1, keepdims=True)
    var = jnp.mean((x - mu) ** 2, axis=-1, keepdims=True)
    return (x - mu) * jax.lax.rsqrt(var + EPS) * g + b


# ----------------------------- fused kernel ----------------------------------

def _gigapath_kernel(px_ref, pw_ref, base_ref,
                     ln1g_ref, ln1b_ref, wq_ref, wk_ref, wv_ref,
                     bq_ref, bk_ref, bv_ref, wo_ref, bo_ref,
                     ln2g_ref, ln2b_ref, w1_ref, b1_ref, w2_ref, b2_ref,
                     lnfg_ref, lnfb_ref,
                     o_ref, x_ref):
    d = pl.program_id(1)                       # layer index (grid axis 1)
    bt = x_ref.shape[0] // SEQ_PAD             # images in this batch tile
    scale = 1.0 / (HEAD_DIM ** 0.5)

    # Patch-embed conv (kernel == stride == PATCH) as one matmul on im2col'd
    # patches pre-scattered (host side) into the padded token-row layout;
    # `base` holds cls token + pos embed + conv bias at the right rows.
    @pl.when(d == 0)
    def _():
        x_ref[...] = (jnp.dot(px_ref[...], pw_ref[...],
                              preferred_element_type=jnp.float32)
                      + base_ref[...])

    x = x_ref[...]

    # Padded key positions (token index >= SEQ) are masked out of the softmax.
    # Padded *query* rows produce values that never feed real rows (keys are
    # masked) and are dropped by the wrapper, so they need no masking.
    key_idx = jax.lax.broadcasted_iota(jnp.int32, (bt, SEQ_PAD, SEQ_PAD), 2)
    key_mask = key_idx < SEQ

    # ---- multi-head self-attention (pre-LN) ----
    h = _layernorm(x, ln1g_ref[...], ln1b_ref[...])
    h_bf = h.astype(jnp.bfloat16)
    attn = None
    for hh in range(HEADS):   # HEADS=2, unrolled; weights pre-split per head
        # on the host so no activation lane slicing / concat is needed.
        q = (jnp.dot(h_bf, wq_ref[hh], preferred_element_type=jnp.float32)
             + bq_ref[hh]) * scale
        k = (jnp.dot(h_bf, wk_ref[hh], preferred_element_type=jnp.float32)
             + bk_ref[hh])
        v = (jnp.dot(h_bf, wv_ref[hh], preferred_element_type=jnp.float32)
             + bv_ref[hh])
        q3 = q.reshape(bt, SEQ_PAD, HEAD_DIM).astype(jnp.bfloat16)
        k3 = k.reshape(bt, SEQ_PAD, HEAD_DIM).astype(jnp.bfloat16)
        v3 = v.reshape(bt, SEQ_PAD, HEAD_DIM).astype(jnp.bfloat16)

        s = jnp.einsum('bqd,bkd->bqk', q3, k3,
                       preferred_element_type=jnp.float32)       # (bt, S, S)
        s = jnp.where(key_mask, s, jnp.float32(-1e30))
        s = s - jnp.max(s, axis=-1, keepdims=True)
        p = jnp.exp(s)
        p = p * pl.reciprocal(jnp.sum(p, axis=-1, keepdims=True), approx=True)
        o3 = jnp.einsum('bqk,bkd->bqd', p.astype(jnp.bfloat16), v3,
                        preferred_element_type=jnp.float32)      # (bt, S, Dh)
        o2 = o3.reshape(bt * SEQ_PAD, HEAD_DIM).astype(jnp.bfloat16)
        contrib = jnp.dot(o2, wo_ref[hh], preferred_element_type=jnp.float32)
        attn = contrib if attn is None else attn + contrib
    x = x + attn + bo_ref[...]

    # ---- MLP ----
    h = _layernorm(x, ln2g_ref[...], ln2b_ref[...])
    m = (jnp.dot(h.astype(jnp.bfloat16), w1_ref[...],
                 preferred_element_type=jnp.float32) + b1_ref[...])
    # timm uses exact (erf) GELU; tanh approximation used for a clean EUP
    # lowering (difference ~1e-3 at these magnitudes).
    m = jax.nn.gelu(m, approximate=True)
    m = (jnp.dot(m.astype(jnp.bfloat16), w2_ref[...],
                 preferred_element_type=jnp.float32) + b2_ref[...])
    x = x + m

    x_ref[...] = x                              # carry across the layer axis

    # Final LayerNorm on every row (LN is per-token, pad rows are free VPU
    # filler) -> dense, unmasked output store; CLS extracted in the wrapper.
    @pl.when(d == DEPTH - 1)
    def _():
        o_ref[...] = _layernorm(x, lnfg_ref[...],
                                lnfb_ref[...]).astype(o_ref.dtype)


# ------------------------------- wrappers -------------------------------------

def gigapath_fused(px, base, p, b_tile):
    M = px.shape[0]                  # B_padded * SEQ_PAD token rows
    bp = M // SEQ_PAD
    nb = bp // b_tile
    mt = b_tile * SEQ_PAD

    def row_spec(cols):              # batch-tiled activation arrays
        return pl.BlockSpec((mt, cols), lambda b, d: (b, 0))

    def full_spec(r, c):             # small arrays resident for the whole call
        return pl.BlockSpec((r, c), lambda b, d: (0, 0))

    def layer_spec(*dims):           # per-layer weight streaming over axis d
        zeros = (0,) * len(dims)
        return pl.BlockSpec((None,) + dims, lambda b, d, _z=zeros: (d,) + _z)

    in_specs = [
        row_spec(PATCH_DIM),                                   # px
        full_spec(PATCH_DIM, EMBED),                           # patch_w
        row_spec(EMBED),                                       # base
        layer_spec(1, EMBED), layer_spec(1, EMBED),            # ln1 g / b
        layer_spec(HEADS, EMBED, HEAD_DIM),                    # wq
        layer_spec(HEADS, EMBED, HEAD_DIM),                    # wk
        layer_spec(HEADS, EMBED, HEAD_DIM),                    # wv
        layer_spec(HEADS, 1, HEAD_DIM),                        # bq
        layer_spec(HEADS, 1, HEAD_DIM),                        # bk
        layer_spec(HEADS, 1, HEAD_DIM),                        # bv
        layer_spec(HEADS, HEAD_DIM, EMBED),                    # wo
        layer_spec(1, EMBED),                                  # bo
        layer_spec(1, EMBED), layer_spec(1, EMBED),            # ln2 g / b
        layer_spec(EMBED, MLP_HID),                            # w1
        layer_spec(1, MLP_HID),                                # b1
        layer_spec(MLP_HID, EMBED),                            # w2
        layer_spec(1, EMBED),                                  # b2
        full_spec(1, EMBED), full_spec(1, EMBED),              # final LN g / b
    ]

    # TODO(synk): at real GigaPath dims (1536d / 40L), split each layer into
    # QKV / proj / MLP-up / MLP-down grid sub-steps so each streamed weight
    # block stays small enough to double-buffer in v7x's 64 MiB VMEM.
    return pl.pallas_call(
        _gigapath_kernel,
        out_shape=jax.ShapeDtypeStruct((M, EMBED), jnp.float32),
        grid_spec=pltpu.PrefetchScalarGridSpec(
            num_scalar_prefetch=0,
            grid=(nb, DEPTH),
            in_specs=in_specs,
            out_specs=pl.BlockSpec((mt, EMBED), lambda b, d: (b, 0)),
            scratch_shapes=[pltpu.VMEM((mt, EMBED), jnp.float32)]),
        compiler_params=pltpu.CompilerParams(
            dimension_semantics=("parallel", "arbitrary"),
            vmem_limit_bytes=32 * 1024 * 1024),
    )(px, p["patch_w"], base,
      p["ln1g"], p["ln1b"], p["wq"], p["wk"], p["wv"],
      p["bq"], p["bk"], p["bv"], p["wo"], p["bo"],
      p["ln2g"], p["ln2b"], p["w1"], p["b1"], p["w2"], p["b2"],
      p["lnf_g"], p["lnf_b"])


def im2col(x):
    # NCHW -> (B, num_patches, C*PATCH*PATCH) with per-patch (C, kh, kw) order,
    # matching PyTorch's Conv2d weight layout (out, in, kh, kw).
    B, C, H, W = x.shape
    gh, gw = H // PATCH, W // PATCH
    x = x.reshape(B, C, gh, PATCH, gw, PATCH)
    x = jnp.transpose(x, (0, 2, 4, 1, 3, 5))
    return x.reshape(B, gh * gw, C * PATCH * PATCH)


def init_params(key):
    ks = iter(jax.random.split(key, 32))
    f32 = jnp.float32

    def nrm(shape, dtype=jnp.bfloat16, scale=0.02):
        return (scale * jax.random.normal(next(ks), shape, f32)).astype(dtype)

    return {
        # matmul weights in bf16 (MXU-native, half the DMA); everything that
        # feeds VPU/EUP math (biases, LN params, cls/pos) stays f32.
        "patch_w": nrm((PATCH_DIM, EMBED)),
        "patch_b": jnp.zeros((1, EMBED), f32),
        "cls": nrm((1, 1, EMBED), dtype=f32),
        "pos": nrm((1, SEQ, EMBED), dtype=f32),
        "ln1g": jnp.ones((DEPTH, 1, EMBED), f32),
        "ln1b": jnp.zeros((DEPTH, 1, EMBED), f32),
        "wq": nrm((DEPTH, HEADS, EMBED, HEAD_DIM)),
        "wk": nrm((DEPTH, HEADS, EMBED, HEAD_DIM)),
        "wv": nrm((DEPTH, HEADS, EMBED, HEAD_DIM)),
        "bq": jnp.zeros((DEPTH, HEADS, 1, HEAD_DIM), f32),
        "bk": jnp.zeros((DEPTH, HEADS, 1, HEAD_DIM), f32),
        "bv": jnp.zeros((DEPTH, HEADS, 1, HEAD_DIM), f32),
        "wo": nrm((DEPTH, HEADS, HEAD_DIM, EMBED)),
        "bo": jnp.zeros((DEPTH, 1, EMBED), f32),
        "ln2g": jnp.ones((DEPTH, 1, EMBED), f32),
        "ln2b": jnp.zeros((DEPTH, 1, EMBED), f32),
        "w1": nrm((DEPTH, EMBED, MLP_HID)),
        "b1": jnp.zeros((DEPTH, 1, MLP_HID), f32),
        "w2": nrm((DEPTH, MLP_HID, EMBED)),
        "b2": jnp.zeros((DEPTH, 1, EMBED), f32),
        "lnf_g": jnp.ones((1, EMBED), f32),
        "lnf_b": jnp.zeros((1, EMBED), f32),
    }


def gigapath_forward(x, params, b_tile=B_TILE):
    """Mirrors GigaPath.forward: embedding = vit(x).squeeze()."""
    B = x.shape[0]
    b_tile = max(1, min(b_tile, B))
    pad_b = (-B) % b_tile
    if pad_b:
        x = jnp.concatenate(
            [x, jnp.zeros((pad_b,) + x.shape[1:], x.dtype)], axis=0)
    Bp = B + pad_b

    # Host-side layout glue: im2col patches scattered into the padded
    # token-row layout (row 0 = cls slot, rows 1..NUM_PATCHES = patches,
    # remaining rows = padding).  The zero rows waste a few matmul rows / KB
    # of bf16 DMA but keep the kernel free of sub-tile sublane scatters; at
    # real GigaPath batch sizes this flips to a dense patch matmul.
    patches = im2col(x)                                        # (Bp, NP, PD)
    px = jnp.concatenate(
        [jnp.zeros((Bp, 1, PATCH_DIM), jnp.float32),
         patches,
         jnp.zeros((Bp, SEQ_PAD - SEQ, PATCH_DIM), jnp.float32)],
        axis=1).reshape(Bp * SEQ_PAD, PATCH_DIM).astype(jnp.bfloat16)

    # cls token + positional embedding + conv bias, pre-scattered to token rows
    base = jnp.concatenate(
        [params["cls"] + params["pos"][:, 0:1, :],
         params["pos"][:, 1:SEQ, :] + params["patch_b"],
         jnp.zeros((1, SEQ_PAD - SEQ, EMBED), jnp.float32)],
        axis=1)                                                # (1, SEQ_PAD, E)
    base = jnp.broadcast_to(base, (Bp, SEQ_PAD, EMBED)).reshape(
        Bp * SEQ_PAD, EMBED)

    out = gigapath_fused(px, base, params, b_tile)             # (Bp*SEQ_PAD, E)
    emb = out.reshape(Bp, SEQ_PAD, EMBED)[:B, 0, :]            # CLS rows
    # mirrors `.squeeze()` in the PyTorch module (no-op for B > 1)
    return jnp.squeeze(emb)


# TODO(synk): get_transforms() (bicubic resize / center-crop / normalize) is
# host-side preprocessing, not part of the forward pass; not implemented here.
# TODO(synk): pretrained HF-hub weight loading is not reproducible in-script;
# deterministic random init is used instead.

if __name__ == "__main__":
    key = jax.random.PRNGKey(0)
    k_x, k_p = jax.random.split(key)
    B = 8
    x = jax.random.normal(k_x, (B, IN_CH, IMG, IMG), jnp.float32)
    params = init_params(k_p)

    out = jax.jit(gigapath_forward)(x, params)
    out = jax.block_until_ready(out)
    assert out.shape == (B, EMBED), out.shape
    assert bool(jnp.all(jnp.isfinite(out)))
    print("KERNEL_OK")
</pallas_src>

<mosaic_0001>
module attributes {stable_mosaic.version = 11 : i64} {
  func.func @_gigapath_kernel(%arg0: i32, %arg1: i32, %arg2: memref<32x192xbf16, #tpu.memory_space<vmem>>, %arg3: memref<192x128xbf16, #tpu.memory_space<vmem>>, %arg4: memref<32x128xf32, #tpu.memory_space<vmem>>, %arg5: memref<1x1x128xf32, #tpu.memory_space<vmem>>, %arg6: memref<1x1x128xf32, #tpu.memory_space<vmem>>, %arg7: memref<1x2x128x64xbf16, #tpu.memory_space<vmem>>, %arg8: memref<1x2x128x64xbf16, #tpu.memory_space<vmem>>, %arg9: memref<1x2x128x64xbf16, #tpu.memory_space<vmem>>, %arg10: memref<1x2x1x64xf32, #tpu.memory_space<vmem>>, %arg11: memref<1x2x1x64xf32, #tpu.memory_space<vmem>>, %arg12: memref<1x2x1x64xf32, #tpu.memory_space<vmem>>, %arg13: memref<1x2x64x128xbf16, #tpu.memory_space<vmem>>, %arg14: memref<1x1x128xf32, #tpu.memory_space<vmem>>, %arg15: memref<1x1x128xf32, #tpu.memory_space<vmem>>, %arg16: memref<1x1x128xf32, #tpu.memory_space<vmem>>, %arg17: memref<1x128x512xbf16, #tpu.memory_space<vmem>>, %arg18: memref<1x1x512xf32, #tpu.memory_space<vmem>>, %arg19: memref<1x512x128xbf16, #tpu.memory_space<vmem>>, %arg20: memref<1x1x128xf32, #tpu.memory_space<vmem>>, %arg21: memref<1x128xf32, #tpu.memory_space<vmem>>, %arg22: memref<1x128xf32, #tpu.memory_space<vmem>>, %arg23: memref<32x128xf32, #tpu.memory_space<vmem>>, %arg24: memref<32x128xf32, #tpu.memory_space<vmem>>) attributes {dimension_semantics = [#tpu.dimension_semantics<parallel>, #tpu.dimension_semantics<arbitrary>], iteration_bounds = array<i64: 2, 2>, scalar_prefetch = 0 : i64, scratch_operands = 1 : i64, tpu.core_type = #tpu.core_type<tc>, window_params = [{transform_indices = @transform_0, window_bounds = array<i64: 32, 192>}, {pipeline_mode = #tpu.pipeline_mode<synchronous>, transform_indices = @transform_1, window_bounds = array<i64: 192, 128>}, {transform_indices = @transform_2, window_bounds = array<i64: 32, 128>}, {transform_indices = @transform_3, window_bounds = array<i64: 1, 1, 128>}, {transform_indices = @transform_4, window_bounds = array<i64: 1, 1, 128>}, {transform_indices = @transform_5, window_bounds = array<i64: 1, 2, 128, 64>}, {transform_indices = @transform_6, window_bounds = array<i64: 1, 2, 128, 64>}, {transform_indices = @transform_7, window_bounds = array<i64: 1, 2, 128, 64>}, {transform_indices = @transform_8, window_bounds = array<i64: 1, 2, 1, 64>}, {transform_indices = @transform_9, window_bounds = array<i64: 1, 2, 1, 64>}, {transform_indices = @transform_10, window_bounds = array<i64: 1, 2, 1, 64>}, {transform_indices = @transform_11, window_bounds = array<i64: 1, 2, 64, 128>}, {transform_indices = @transform_12, window_bounds = array<i64: 1, 1, 128>}, {transform_indices = @transform_13, window_bounds = array<i64: 1, 1, 128>}, {transform_indices = @transform_14, window_bounds = array<i64: 1, 1, 128>}, {transform_indices = @transform_15, window_bounds = array<i64: 1, 128, 512>}, {transform_indices = @transform_16, window_bounds = array<i64: 1, 1, 512>}, {transform_indices = @transform_17, window_bounds = array<i64: 1, 512, 128>}, {transform_indices = @transform_18, window_bounds = array<i64: 1, 1, 128>}, {pipeline_mode = #tpu.pipeline_mode<synchronous>, transform_indices = @transform_19, window_bounds = array<i64: 1, 128>}, {pipeline_mode = #tpu.pipeline_mode<synchronous>, transform_indices = @transform_20, window_bounds = array<i64: 1, 128>}, {transform_indices = @transform_21, window_bounds = array<i64: 32, 128>}]} {
    %c0_i32 = arith.constant 0 : i32
    %0 = arith.cmpi eq, %arg1, %c0_i32 : i32
    %1 = arith.extui %0 : i1 to i32
    %c0_i32_0 = arith.constant 0 : i32
    %2 = arith.cmpi ne, %1, %c0_i32_0 : i32
    scf.if %2 {
      %c0_122 = arith.constant 0 : index
      %c0_123 = arith.constant 0 : index
      %198 = vector.load %arg2[%c0_122, %c0_123] : memref<32x192xbf16, #tpu.memory_space<vmem>>, vector<32x192xbf16>
      %c0_124 = arith.constant 0 : index
      %c0_125 = arith.constant 0 : index
      %199 = vector.load %arg3[%c0_124, %c0_125] : memref<192x128xbf16, #tpu.memory_space<vmem>>, vector<192x128xbf16>
      %cst_126 = arith.constant dense<0.000000e+00> : vector<32x128xf32>
      %200 = tpu.matmul %198, %199, %cst_126 {dimension_numbers = #tpu.dot_dimension_numbers<[1], [0], [0], [1], [0, 0, 1, 1], [], []>} : vector<32x192xbf16>, vector<192x128xbf16>, vector<32x128xf32> -> vector<32x128xf32>
      %c0_127 = arith.constant 0 : index
      %c0_128 = arith.constant 0 : index
      %201 = vector.load %arg4[%c0_127, %c0_128] : memref<32x128xf32, #tpu.memory_space<vmem>>, vector<32x128xf32>
      %202 = arith.addf %200, %201 : vector<32x128xf32>
      %c0_129 = arith.constant 0 : index
      %c0_130 = arith.constant 0 : index
      %203 = vector.load %arg24[%c0_129, %c0_130] : memref<32x128xf32, #tpu.memory_space<vmem>>, vector<32x128xf32>
      tpu.vector_store %arg24[%c0_129, %c0_130], %202 {strides = array<i32>} : memref<32x128xf32, #tpu.memory_space<vmem>>, vector<32x128xf32>,
    } else {
    }
    %c0 = arith.constant 0 : index
    %c0_1 = arith.constant 0 : index
    %3 = vector.load %arg24[%c0, %c0_1] : memref<32x128xf32, #tpu.memory_space<vmem>>, vector<32x128xf32>
    %4 = tpu.iota {dimensions = array<i32: 2>} : vector<4x8x8xi32>
    %c5_i32 = arith.constant 5 : i32
    %5 = vector.broadcast %c5_i32 : i32 to vector<4x8x8xi32>
    %6 = arith.cmpi slt, %4, %5 : vector<4x8x8xi32>
    %c0_2 = arith.constant 0 : index
    %c0_3 = arith.constant 0 : index
    %c0_4 = arith.constant 0 : index
    %7 = vector.load %arg5[%c0_2, %c0_3, %c0_4] : memref<1x1x128xf32, #tpu.memory_space<vmem>>, vector<1x1x128xf32>
    %8 = vector.shape_cast %7 : vector<1x1x128xf32> to vector<1x128xf32>
    %c0_5 = arith.constant 0 : index
    %c0_6 = arith.constant 0 : index
    %c0_7 = arith.constant 0 : index
    %9 = vector.load %arg6[%c0_5, %c0_6, %c0_7] : memref<1x1x128xf32, #tpu.memory_space<vmem>>, vector<1x1x128xf32>
    %10 = vector.shape_cast %9 : vector<1x1x128xf32> to vector<1x128xf32>
    %cst = arith.constant dense<0.000000e+00> : vector<32xf32>
    %11 = vector.multi_reduction <add>, %3, %cst [1] : vector<32x128xf32> to vector<32xf32>
    %12 = vector.shape_cast %11 : vector<32xf32> to vector<32x1xf32>
    %cst_8 = arith.constant 1.280000e+02 : f32
    %13 = vector.broadcast %cst_8 : f32 to vector<32x1xf32>
    %14 = arith.divf %12, %13 : vector<32x1xf32>
    %15 = vector.broadcast %14 : vector<32x1xf32> to vector<32x128xf32>
    %16 = arith.subf %3, %15 : vector<32x128xf32>
    %17 = arith.mulf %16, %16 : vector<32x128xf32>
    %cst_9 = arith.constant dense<0.000000e+00> : vector<32xf32>
    %18 = vector.multi_reduction <add>, %17, %cst_9 [1] : vector<32x128xf32> to vector<32xf32>
    %19 = vector.shape_cast %18 : vector<32xf32> to vector<32x1xf32>
    %cst_10 = arith.constant 1.280000e+02 : f32
    %20 = vector.broadcast %cst_10 : f32 to vector<32x1xf32>
    %21 = arith.divf %19, %20 : vector<32x1xf32>
    %22 = vector.broadcast %14 : vector<32x1xf32> to vector<32x128xf32>
    %23 = arith.subf %3, %22 : vector<32x128xf32>
    %cst_11 = arith.constant 9.99999997E-7 : f32
    %24 = vector.broadcast %cst_11 : f32 to vector<32x1xf32>
    %25 = arith.addf %21, %24 : vector<32x1xf32>
    %26 = math.rsqrt %25 : vector<32x1xf32>
    %27 = vector.broadcast %26 : vector<32x1xf32> to vector<32x128xf32>
    %28 = arith.mulf %23, %27 : vector<32x128xf32>
    %29 = vector.broadcast %8 : vector<1x128xf32> to vector<32x128xf32>
    %30 = arith.mulf %28, %29 : vector<32x128xf32>
    %31 = vector.broadcast %10 : vector<1x128xf32> to vector<32x128xf32>
    %32 = arith.addf %30, %31 : vector<32x128xf32>
    %33 = arith.truncf %32 : vector<32x128xf32> to vector<32x128xbf16>
    %c0_12 = arith.constant 0 : index
    %c0_13 = arith.constant 0 : index
    %c0_14 = arith.constant 0 : index
    %c0_15 = arith.constant 0 : index
    %34 = vector.load %arg7[%c0_12, %c0_13, %c0_14, %c0_15] : memref<1x2x128x64xbf16, #tpu.memory_space<vmem>>, vector<1x1x128x64xbf16>
    %35 = vector.shape_cast %34 : vector<1x1x128x64xbf16> to vector<128x64xbf16>
    %cst_16 = arith.constant dense<0.000000e+00> : vector<32x64xf32>
    %36 = tpu.matmul %33, %35, %cst_16 {dimension_numbers = #tpu.dot_dimension_numbers<[1], [0], [0], [1], [0, 0, 1, 1], [], []>} : vector<32x128xbf16>, vector<128x64xbf16>, vector<32x64xf32> -> vector<32x64xf32>
    %c0_17 = arith.constant 0 : index
    %c0_18 = arith.constant 0 : index
    %c0_19 = arith.constant 0 : index
    %c0_20 = arith.constant 0 : index
    %37 = vector.load %arg10[%c0_17, %c0_18, %c0_19, %c0_20] : memref<1x2x1x64xf32, #tpu.memory_space<vmem>>, vector<1x1x1x64xf32>
    %38 = vector.shape_cast %37 : vector<1x1x1x64xf32> to vector<1x64xf32>
    %39 = vector.broadcast %38 : vector<1x64xf32> to vector<32x64xf32>
    %40 = arith.addf %36, %39 : vector<32x64xf32>
    %cst_21 = arith.constant 1.250000e-01 : f32
    %41 = vector.broadcast %cst_21 : f32 to vector<32x64xf32>
    %42 = arith.mulf %40, %41 : vector<32x64xf32>
    %c0_22 = arith.constant 0 : index
    %c0_23 = arith.constant 0 : index
    %c0_24 = arith.constant 0 : index
    %c0_25 = arith.constant 0 : index
    %43 = vector.load %arg8[%c0_22, %c0_23, %c0_24, %c0_25] : memref<1x2x128x64xbf16, #tpu.memory_space<vmem>>, vector<1x1x128x64xbf16>
    %44 = vector.shape_cast %43 : vector<1x1x128x64xbf16> to vector<128x64xbf16>
    %cst_26 = arith.constant dense<0.000000e+00> : vector<32x64xf32>
    %45 = tpu.matmul %33, %44, %cst_26 {dimension_numbers = #tpu.dot_dimension_numbers<[1], [0], [0], [1], [0, 0, 1, 1], [], []>} : vector<32x128xbf16>, vector<128x64xbf16>, vector<32x64xf32> -> vector<32x64xf32>
    %c0_27 = arith.constant 0 : index
    %c0_28 = arith.constant 0 : index
    %c0_29 = arith.constant 0 : index
    %c0_30 = arith.constant 0 : index
    %46 = vector.load %arg11[%c0_27, %c0_28, %c0_29, %c0_30] : memref<1x2x1x64xf32, #tpu.memory_space<vmem>>, vector<1x1x1x64xf32>
    %47 = vector.shape_cast %46 : vector<1x1x1x64xf32> to vector<1x64xf32>
    %48 = vector.broadcast %47 : vector<1x64xf32> to vector<32x64xf32>
    %49 = arith.addf %45, %48 : vector<32x64xf32>
    %c0_31 = arith.constant 0 : index
    %c0_32 = arith.constant 0 : index
    %c0_33 = arith.constant 0 : index
    %c0_34 = arith.constant 0 : index
    %50 = vector.load %arg9[%c0_31, %c0_32, %c0_33, %c0_34] : memref<1x2x128x64xbf16, #tpu.memory_space<vmem>>, vector<1x1x128x64xbf16>
    %51 = vector.shape_cast %50 : vector<1x1x128x64xbf16> to vector<128x64xbf16>
    %cst_35 = arith.constant dense<0.000000e+00> : vector<32x64xf32>
    %52 = tpu.matmul %33, %51, %cst_35 {dimension_numbers = #tpu.dot_dimension_numbers<[1], [0], [0], [1], [0, 0, 1, 1], [], []>} : vector<32x128xbf16>, vector<128x64xbf16>, vector<32x64xf32> -> vector<32x64xf32>
    %c0_36 = arith.constant 0 : index
    %c0_37 = arith.constant 0 : index
    %c0_38 = arith.constant 0 : index
    %c0_39 = arith.constant 0 : index
    %53 = vector.load %arg12[%c0_36, %c0_37, %c0_38, %c0_39] : memref<1x2x1x64xf32, #tpu.memory_space<vmem>>, vector<1x1x1x64xf32>
    %54 = vector.shape_cast %53 : vector<1x1x1x64xf32> to vector<1x64xf32>
    %55 = vector.broadcast %54 : vector<1x64xf32> to vector<32x64xf32>
    %56 = arith.addf %52, %55 : vector<32x64xf32>
    %57 = vector.shape_cast %42 : vector<32x64xf32> to vector<4x8x64xf32>
    %58 = arith.truncf %57 : vector<4x8x64xf32> to vector<4x8x64xbf16>
    %59 = vector.shape_cast %49 : vector<32x64xf32> to vector<4x8x64xf32>
    %60 = arith.truncf %59 : vector<4x8x64xf32> to vector<4x8x64xbf16>
    %61 = vector.shape_cast %56 : vector<32x64xf32> to vector<4x8x64xf32>
    %62 = arith.truncf %61 : vector<4x8x64xf32> to vector<4x8x64xbf16>
    "tpu.trace_start"() <{level = 10 : i32, message = "bqd,bkd->bqk"}> : () -> ()
    %cst_40 = arith.constant dense<0.000000e+00> : vector<4x8x8xf32>
    %63 = tpu.matmul %58, %60, %cst_40 {dimension_numbers = #tpu.dot_dimension_numbers<[2], [2], [1], [1], [0, 0, 0, 1, 1, 1], [0], [0]>} : vector<4x8x64xbf16>, vector<4x8x64xbf16>, vector<4x8x8xf32> -> vector<4x8x8xf32>
    %cst_41 = arith.constant -1.000000e+30 : f32
    "tpu.trace_stop"() : () -> ()
    %64 = vector.broadcast %cst_41 : f32 to vector<4x8x8xf32>
    %65 = arith.select %6, %63, %64 : vector<4x8x8xi1>, vector<4x8x8xf32>
    %cst_42 = arith.constant dense<0xFF800000> : vector<4x8xf32>
    %66 = vector.multi_reduction <maximumf>, %65, %cst_42 [2] : vector<4x8x8xf32> to vector<4x8xf32>
    %67 = vector.shape_cast %66 : vector<4x8xf32> to vector<4x8x1xf32>
    %68 = vector.broadcast %67 : vector<4x8x1xf32> to vector<4x8x8xf32>
    %69 = arith.subf %65, %68 : vector<4x8x8xf32>
    %70 = math.exp %69 : vector<4x8x8xf32>
    %cst_43 = arith.constant dense<0.000000e+00> : vector<4x8xf32>
    %71 = vector.multi_reduction <add>, %70, %cst_43 [2] : vector<4x8x8xf32> to vector<4x8xf32>
    %72 = vector.shape_cast %71 : vector<4x8xf32> to vector<4x8x1xf32>
    %73 = tpu.reciprocal %72 {approx = true} : vector<4x8x1xf32> -> vector<4x8x1xf32>
    %74 = vector.broadcast %73 : vector<4x8x1xf32> to vector<4x8x8xf32>
    %75 = arith.mulf %70, %74 : vector<4x8x8xf32>
    %76 = arith.truncf %75 : vector<4x8x8xf32> to vector<4x8x8xbf16>
    "tpu.trace_start"() <{level = 10 : i32, message = "bqk,bkd->bqd"}> : () -> ()
    %cst_44 = arith.constant dense<0.000000e+00> : vector<4x8x64xf32>
    %77 = tpu.matmul %76, %62, %cst_44 {dimension_numbers = #tpu.dot_dimension_numbers<[2], [1], [1], [2], [0, 0, 0, 1, 1, 2], [0], [0]>} : vector<4x8x8xbf16>, vector<4x8x64xbf16>, vector<4x8x64xf32> -> vector<4x8x64xf32>
    "tpu.trace_stop"() : () -> ()
    %78 = vector.shape_cast %77 : vector<4x8x64xf32> to vector<32x64xf32>
    %79 = arith.truncf %78 : vector<32x64xf32> to vector<32x64xbf16>
    %c0_45 = arith.constant 0 : index
    %c0_46 = arith.constant 0 : index
    %c0_47 = arith.constant 0 : index
    %c0_48 = arith.constant 0 : index
    %80 = vector.load %arg13[%c0_45, %c0_46, %c0_47, %c0_48] : memref<1x2x64x128xbf16, #tpu.memory_space<vmem>>, vector<1x1x64x128xbf16>
    %81 = vector.shape_cast %80 : vector<1x1x64x128xbf16> to vector<64x128xbf16>
    %cst_49 = arith.constant dense<0.000000e+00> : vector<32x128xf32>
    %82 = tpu.matmul %79, %81, %cst_49 {dimension_numbers = #tpu.dot_dimension_numbers<[1], [0], [0], [1], [0, 0, 1, 1], [], []>} : vector<32x64xbf16>, vector<64x128xbf16>, vector<32x128xf32> -> vector<32x128xf32>
    %c0_50 = arith.constant 0 : index
    %c1 = arith.constant 1 : index
    %c0_51 = arith.constant 0 : index
    %c0_52 = arith.constant 0 : index
    %83 = vector.load %arg7[%c0_50, %c1, %c0_51, %c0_52] : memref<1x2x128x64xbf16, #tpu.memory_space<vmem>>, vector<1x1x128x64xbf16>
    %84 = vector.shape_cast %83 : vector<1x1x128x64xbf16> to vector<128x64xbf16>
    %cst_53 = arith.constant dense<0.000000e+00> : vector<32x64xf32>
    %85 = tpu.matmul %33, %84, %cst_53 {dimension_numbers = #tpu.dot_dimension_numbers<[1], [0], [0], [1], [0, 0, 1, 1], [], []>} : vector<32x128xbf16>, vector<128x64xbf16>, vector<32x64xf32> -> vector<32x64xf32>
    %c0_54 = arith.constant 0 : index
    %c1_55 = arith.constant 1 : index
    %c0_56 = arith.constant 0 : index
    %c0_57 = arith.constant 0 : index
    %86 = vector.load %arg10[%c0_54, %c1_55, %c0_56, %c0_57] : memref<1x2x1x64xf32, #tpu.memory_space<vmem>>, vector<1x1x1x64xf32>
    %87 = vector.shape_cast %86 : vector<1x1x1x64xf32> to vector<1x64xf32>
    %88 = vector.broadcast %87 : vector<1x64xf32> to vector<32x64xf32>
    %89 = arith.addf %85, %88 : vector<32x64xf32>
    %cst_58 = arith.constant 1.250000e-01 : f32
    %90 = vector.broadcast %cst_58 : f32 to vector<32x64xf32>
    %91 = arith.mulf %89, %90 : vector<32x64xf32>
    %c0_59 = arith.constant 0 : index
    %c1_60 = arith.constant 1 : index
    %c0_61 = arith.constant 0 : index
    %c0_62 = arith.constant 0 : index
    %92 = vector.load %arg8[%c0_59, %c1_60, %c0_61, %c0_62] : memref<1x2x128x64xbf16, #tpu.memory_space<vmem>>, vector<1x1x128x64xbf16>
    %93 = vector.shape_cast %92 : vector<1x1x128x64xbf16> to vector<128x64xbf16>
    %cst_63 = arith.constant dense<0.000000e+00> : vector<32x64xf32>
    %94 = tpu.matmul %33, %93, %cst_63 {dimension_numbers = #tpu.dot_dimension_numbers<[1], [0], [0], [1], [0, 0, 1, 1], [], []>} : vector<32x128xbf16>, vector<128x64xbf16>, vector<32x64xf32> -> vector<32x64xf32>
    %c0_64 = arith.constant 0 : index
    %c1_65 = arith.constant 1 : index
    %c0_66 = arith.constant 0 : index
    %c0_67 = arith.constant 0 : index
    %95 = vector.load %arg11[%c0_64, %c1_65, %c0_66, %c0_67] : memref<1x2x1x64xf32, #tpu.memory_space<vmem>>, vector<1x1x1x64xf32>
    %96 = vector.shape_cast %95 : vector<1x1x1x64xf32> to vector<1x64xf32>
    %97 = vector.broadcast %96 : vector<1x64xf32> to vector<32x64xf32>
    %98 = arith.addf %94, %97 : vector<32x64xf32>
    %c0_68 = arith.constant 0 : index
    %c1_69 = arith.constant 1 : index
    %c0_70 = arith.constant 0 : index
    %c0_71 = arith.constant 0 : index
    %99 = vector.load %arg9[%c0_68, %c1_69, %c0_70, %c0_71] : memref<1x2x128x64xbf16, #tpu.memory_space<vmem>>, vector<1x1x128x64xbf16>
    %100 = vector.shape_cast %99 : vector<1x1x128x64xbf16> to vector<128x64xbf16>
    %cst_72 = arith.constant dense<0.000000e+00> : vector<32x64xf32>
    %101 = tpu.matmul %33, %100, %cst_72 {dimension_numbers = #tpu.dot_dimension_numbers<[1], [0], [0], [1], [0, 0, 1, 1], [], []>} : vector<32x128xbf16>, vector<128x64xbf16>, vector<32x64xf32> -> vector<32x64xf32>
    %c0_73 = arith.constant 0 : index
    %c1_74 = arith.constant 1 : index
    %c0_75 = arith.constant 0 : index
    %c0_76 = arith.constant 0 : index
    %102 = vector.load %arg12[%c0_73, %c1_74, %c0_75, %c0_76] : memref<1x2x1x64xf32, #tpu.memory_space<vmem>>, vector<1x1x1x64xf32>
    %103 = vector.shape_cast %102 : vector<1x1x1x64xf32> to vector<1x64xf32>
    %104 = vector.broadcast %103 : vector<1x64xf32> to vector<32x64xf32>
    %105 = arith.addf %101, %104 : vector<32x64xf32>
    %106 = vector.shape_cast %91 : vector<32x64xf32> to vector<4x8x64xf32>
    %107 = arith.truncf %106 : vector<4x8x64xf32> to vector<4x8x64xbf16>
    %108 = vector.shape_cast %98 : vector<32x64xf32> to vector<4x8x64xf32>
    %109 = arith.truncf %108 : vector<4x8x64xf32> to vector<4x8x64xbf16>
    %110 = vector.shape_cast %105 : vector<32x64xf32> to vector<4x8x64xf32>
    %111 = arith.truncf %110 : vector<4x8x64xf32> to vector<4x8x64xbf16>
    "tpu.trace_start"() <{level = 10 : i32, message = "bqd,bkd->bqk"}> : () -> ()
    %cst_77 = arith.constant dense<0.000000e+00> : vector<4x8x8xf32>
    %112 = tpu.matmul %107, %109, %cst_77 {dimension_numbers = #tpu.dot_dimension_numbers<[2], [2], [1], [1], [0, 0, 0, 1, 1, 1], [0], [0]>} : vector<4x8x64xbf16>, vector<4x8x64xbf16>, vector<4x8x8xf32> -> vector<4x8x8xf32>
    %cst_78 = arith.constant -1.000000e+30 : f32
    "tpu.trace_stop"() : () -> ()
    %113 = vector.broadcast %cst_78 : f32 to vector<4x8x8xf32>
    %114 = arith.select %6, %112, %113 : vector<4x8x8xi1>, vector<4x8x8xf32>
    %cst_79 = arith.constant dense<0xFF800000> : vector<4x8xf32>
    %115 = vector.multi_reduction <maximumf>, %114, %cst_79 [2] : vector<4x8x8xf32> to vector<4x8xf32>
    %116 = vector.shape_cast %115 : vector<4x8xf32> to vector<4x8x1xf32>
    %117 = vector.broadcast %116 : vector<4x8x1xf32> to vector<4x8x8xf32>
    %118 = arith.subf %114, %117 : vector<4x8x8xf32>
    %119 = math.exp %118 : vector<4x8x8xf32>
    %cst_80 = arith.constant dense<0.000000e+00> : vector<4x8xf32>
    %120 = vector.multi_reduction <add>, %119, %cst_80 [2] : vector<4x8x8xf32> to vector<4x8xf32>
    %121 = vector.shape_cast %120 : vector<4x8xf32> to vector<4x8x1xf32>
    %122 = tpu.reciprocal %121 {approx = true} : vector<4x8x1xf32> -> vector<4x8x1xf32>
    %123 = vector.broadcast %122 : vector<4x8x1xf32> to vector<4x8x8xf32>
    %124 = arith.mulf %119, %123 : vector<4x8x8xf32>
    %125 = arith.truncf %124 : vector<4x8x8xf32> to vector<4x8x8xbf16>
    "tpu.trace_start"() <{level = 10 : i32, message = "bqk,bkd->bqd"}> : () -> ()
    %cst_81 = arith.constant dense<0.000000e+00> : vector<4x8x64xf32>
    %126 = tpu.matmul %125, %111, %cst_81 {dimension_numbers = #tpu.dot_dimension_numbers<[2], [1], [1], [2], [0, 0, 0, 1, 1, 2], [0], [0]>} : vector<4x8x8xbf16>, vector<4x8x64xbf16>, vector<4x8x64xf32> -> vector<4x8x64xf32>
    "tpu.trace_stop"() : () -> ()
    %127 = vector.shape_cast %126 : vector<4x8x64xf32> to vector<32x64xf32>
    %128 = arith.truncf %127 : vector<32x64xf32> to vector<32x64xbf16>
    %c0_82 = arith.constant 0 : index
    %c1_83 = arith.constant 1 : index
    %c0_84 = arith.constant 0 : index
    %c0_85 = arith.constant 0 : index
    %129 = vector.load %arg13[%c0_82, %c1_83, %c0_84, %c0_85] : memref<1x2x64x128xbf16, #tpu.memory_space<vmem>>, vector<1x1x64x128xbf16>
    %130 = vector.shape_cast %129 : vector<1x1x64x128xbf16> to vector<64x128xbf16>
    %cst_86 = arith.constant dense<0.000000e+00> : vector<32x128xf32>
    %131 = tpu.matmul %128, %130, %cst_86 {dimension_numbers = #tpu.dot_dimension_numbers<[1], [0], [0], [1], [0, 0, 1, 1], [], []>} : vector<32x64xbf16>, vector<64x128xbf16>, vector<32x128xf32> -> vector<32x128xf32>
    %132 = arith.addf %82, %131 : vector<32x128xf32>
    %133 = arith.addf %3, %132 : vector<32x128xf32>
    %c0_87 = arith.constant 0 : index
    %c0_88 = arith.constant 0 : index
    %c0_89 = arith.constant 0 : index
    %134 = vector.load %arg14[%c0_87, %c0_88, %c0_89] : memref<1x1x128xf32, #tpu.memory_space<vmem>>, vector<1x1x128xf32>
    %135 = vector.shape_cast %134 : vector<1x1x128xf32> to vector<1x128xf32>
    %136 = vector.broadcast %135 : vector<1x128xf32> to vector<32x128xf32>
    %137 = arith.addf %133, %136 : vector<32x128xf32>
    %c0_90 = arith.constant 0 : index
    %c0_91 = arith.constant 0 : index
    %c0_92 = arith.constant 0 : index
    %138 = vector.load %arg15[%c0_90, %c0_91, %c0_92] : memref<1x1x128xf32, #tpu.memory_space<vmem>>, vector<1x1x128xf32>
    %139 = vector.shape_cast %138 : vector<1x1x128xf32> to vector<1x128xf32>
    %c0_93 = arith.constant 0 : index
    %c0_94 = arith.constant 0 : index
    %c0_95 = arith.constant 0 : index
    %140 = vector.load %arg16[%c0_93, %c0_94, %c0_95] : memref<1x1x128xf32, #tpu.memory_space<vmem>>, vector<1x1x128xf32>
    %141 = vector.shape_cast %140 : vector<1x1x128xf32> to vector<1x128xf32>
    %cst_96 = arith.constant dense<0.000000e+00> : vector<32xf32>
    %142 = vector.multi_reduction <add>, %137, %cst_96 [1] : vector<32x128xf32> to vector<32xf32>
    %143 = vector.shape_cast %142 : vector<32xf32> to vector<32x1xf32>
    %cst_97 = arith.constant 1.280000e+02 : f32
    %144 = vector.broadcast %cst_97 : f32 to vector<32x1xf32>
    %145 = arith.divf %143, %144 : vector<32x1xf32>
    %146 = vector.broadcast %145 : vector<32x1xf32> to vector<32x128xf32>
    %147 = arith.subf %137, %146 : vector<32x128xf32>
    %148 = arith.mulf %147, %147 : vector<32x128xf32>
    %cst_98 = arith.constant dense<0.000000e+00> : vector<32xf32>
    %149 = vector.multi_reduction <add>, %148, %cst_98 [1] : vector<32x128xf32> to vector<32xf32>
    %150 = vector.shape_cast %149 : vector<32xf32> to vector<32x1xf32>
    %cst_99 = arith.constant 1.280000e+02 : f32
    %151 = vector.broadcast %cst_99 : f32 to vector<32x1xf32>
    %152 = arith.divf %150, %151 : vector<32x1xf32>
    %153 = vector.broadcast %145 : vector<32x1xf32> to vector<32x128xf32>
    %154 = arith.subf %137, %153 : vector<32x128xf32>
    %cst_100 = arith.constant 9.99999997E-7 : f32
    %155 = vector.broadcast %cst_100 : f32 to vector<32x1xf32>
    %156 = arith.addf %152, %155 : vector<32x1xf32>
    %157 = math.rsqrt %156 : vector<32x1xf32>
    %158 = vector.broadcast %157 : vector<32x1xf32> to vector<32x128xf32>
    %159 = arith.mulf %154, %158 : vector<32x128xf32>
    %160 = vector.broadcast %139 : vector<1x128xf32> to vector<32x128xf32>
    %161 = arith.mulf %159, %160 : vector<32x128xf32>
    %162 = vector.broadcast %141 : vector<1x128xf32> to vector<32x128xf32>
    %163 = arith.addf %161, %162 : vector<32x128xf32>
    %164 = arith.truncf %163 : vector<32x128xf32> to vector<32x128xbf16>
    %c0_101 = arith.constant 0 : index
    %c0_102 = arith.constant 0 : index
    %c0_103 = arith.constant 0 : index
    %165 = vector.load %arg17[%c0_101, %c0_102, %c0_103] : memref<1x128x512xbf16, #tpu.memory_space<vmem>>, vector<1x128x512xbf16>
    %166 = vector.shape_cast %165 : vector<1x128x512xbf16> to vector<128x512xbf16>
    %cst_104 = arith.constant dense<0.000000e+00> : vector<32x512xf32>
    %167 = tpu.matmul %164, %166, %cst_104 {dimension_numbers = #tpu.dot_dimension_numbers<[1], [0], [0], [1], [0, 0, 1, 1], [], []>} : vector<32x128xbf16>, vector<128x512xbf16>, vector<32x512xf32> -> vector<32x512xf32>
    %c0_105 = arith.constant 0 : index
    %c0_106 = arith.constant 0 : index
    %c0_107 = arith.constant 0 : index
    %168 = vector.load %arg18[%c0_105, %c0_106, %c0_107] : memref<1x1x512xf32, #tpu.memory_space<vmem>>, vector<1x1x512xf32>
    %169 = vector.shape_cast %168 : vector<1x1x512xf32> to vector<1x512xf32>
    %170 = vector.broadcast %169 : vector<1x512xf32> to vector<32x512xf32>
    %171 = arith.addf %167, %170 : vector<32x512xf32>
    %172 = arith.mulf %171, %171 : vector<32x512xf32>
    %173 = arith.mulf %171, %172 : vector<32x512xf32>
    %cst_108 = arith.constant 4.471500e-02 : f32
    %174 = vector.broadcast %cst_108 : f32 to vector<32x512xf32>
    %175 = arith.mulf %174, %173 : vector<32x512xf32>
    %176 = arith.addf %171, %175 : vector<32x512xf32>
    %cst_109 = arith.constant 0.797884583 : f32
    %177 = vector.broadcast %cst_109 : f32 to vector<32x512xf32>
    %178 = arith.mulf %177, %176 : vector<32x512xf32>
    %179 = math.tanh %178 : vector<32x512xf32>
    %cst_110 = arith.constant 1.000000e+00 : f32
    %180 = vector.broadcast %cst_110 : f32 to vector<32x512xf32>
    %181 = arith.addf %180, %179 : vector<32x512xf32>
    %cst_111 = arith.constant 5.000000e-01 : f32
    %182 = vector.broadcast %cst_111 : f32 to vector<32x512xf32>
    %183 = arith.mulf %182, %181 : vector<32x512xf32>
    %184 = arith.mulf %171, %183 : vector<32x512xf32>
    %185 = arith.truncf %184 : vector<32x512xf32> to vector<32x512xbf16>
    %c0_112 = arith.constant 0 : index
    %c0_113 = arith.constant 0 : index
    %c0_114 = arith.constant 0 : index
    %186 = vector.load %arg19[%c0_112, %c0_113, %c0_114] : memref<1x512x128xbf16, #tpu.memory_space<vmem>>, vector<1x512x128xbf16>
    %187 = vector.shape_cast %186 : vector<1x512x128xbf16> to vector<512x128xbf16>
    %cst_115 = arith.constant dense<0.000000e+00> : vector<32x128xf32>
    %188 = tpu.matmul %185, %187, %cst_115 {dimension_numbers = #tpu.dot_dimension_numbers<[1], [0], [0], [1], [0, 0, 1, 1], [], []>} : vector<32x512xbf16>, vector<512x128xbf16>, vector<32x128xf32> -> vector<32x128xf32>
    %c0_116 = arith.constant 0 : index
    %c0_117 = arith.constant 0 : index
    %c0_118 = arith.constant 0 : index
    %189 = vector.load %arg20[%c0_116, %c0_117, %c0_118] : memref<1x1x128xf32, #tpu.memory_space<vmem>>, vector<1x1x128xf32>
    %190 = vector.shape_cast %189 : vector<1x1x128xf32> to vector<1x128xf32>
    %191 = vector.broadcast %190 : vector<1x128xf32> to vector<32x128xf32>
    %192 = arith.addf %188, %191 : vector<32x128xf32>
    %193 = arith.addf %137, %192 : vector<32x128xf32>
    %c0_119 = arith.constant 0 : index
    %c0_120 = arith.constant 0 : index
    %194 = vector.load %arg24[%c0_119, %c0_120] : memref<32x128xf32, #tpu.memory_space<vmem>>, vector<32x128xf32>
    tpu.vector_store %arg24[%c0_119, %c0_120], %193 {strides = array<i32>} : memref<32x128xf32, #tpu.memory_space<vmem>>, vector<32x128xf32>,
    %c1_i32 = arith.constant 1 : i32
    %195 = arith.cmpi eq, %arg1, %c1_i32 : i32
    %196 = arith.extui %195 : i1 to i32
    %c0_i32_121 = arith.constant 0 : i32
    %197 = arith.cmpi ne, %196, %c0_i32_121 : i32
    scf.if %197 {
      %c0_122 = arith.constant 0 : index
      %c0_123 = arith.constant 0 : index
      %198 = vector.load %arg21[%c0_122, %c0_123] : memref<1x128xf32, #tpu.memory_space<vmem>>, vector<1x128xf32>
      %c0_124 = arith.constant 0 : index
      %c0_125 = arith.constant 0 : index
      %199 = vector.load %arg22[%c0_124, %c0_125] : memref<1x128xf32, #tpu.memory_space<vmem>>, vector<1x128xf32>
      %cst_126 = arith.constant dense<0.000000e+00> : vector<32xf32>
      %200 = vector.multi_reduction <add>, %193, %cst_126 [1] : vector<32x128xf32> to vector<32xf32>
      %201 = vector.shape_cast %200 : vector<32xf32> to vector<32x1xf32>
      %cst_127 = arith.constant 1.280000e+02 : f32
      %202 = vector.broadcast %cst_127 : f32 to vector<32x1xf32>
      %203 = arith.divf %201, %202 : vector<32x1xf32>
      %204 = vector.broadcast %203 : vector<32x1xf32> to vector<32x128xf32>
      %205 = arith.subf %193, %204 : vector<32x128xf32>
      %206 = arith.mulf %205, %205 : vector<32x128xf32>
      %cst_128 = arith.constant dense<0.000000e+00> : vector<32xf32>
      %207 = vector.multi_reduction <add>, %206, %cst_128 [1] : vector<32x128xf32> to vector<32xf32>
      %208 = vector.shape_cast %207 : vector<32xf32> to vector<32x1xf32>
      %cst_129 = arith.constant 1.280000e+02 : f32
      %209 = vector.broadcast %cst_129 : f32 to vector<32x1xf32>
      %210 = arith.divf %208, %209 : vector<32x1xf32>
      %211 = vector.broadcast %203 : vector<32x1xf32> to vector<32x128xf32>
      %212 = arith.subf %193, %211 : vector<32x128xf32>
      %cst_130 = arith.constant 9.99999997E-7 : f32
      %213 = vector.broadcast %cst_130 : f32 to vector<32x1xf32>
      %214 = arith.addf %210, %213 : vector<32x1xf32>
      %215 = math.rsqrt %214 : vector<32x1xf32>
      %216 = vector.broadcast %215 : vector<32x1xf32> to vector<32x128xf32>
      %217 = arith.mulf %212, %216 : vector<32x128xf32>
      %218 = vector.broadcast %198 : vector<1x128xf32> to vector<32x128xf32>
      %219 = arith.mulf %217, %218 : vector<32x128xf32>
      %220 = vector.broadcast %199 : vector<1x128xf32> to vector<32x128xf32>
      %221 = arith.addf %219, %220 : vector<32x128xf32>
      %c0_131 = arith.constant 0 : index
      %c0_132 = arith.constant 0 : index
      %222 = vector.load %arg23[%c0_131, %c0_132] : memref<32x128xf32, #tpu.memory_space<vmem>>, vector<32x128xf32>
      tpu.vector_store %arg23[%c0_131, %c0_132], %221 {strides = array<i32>} : memref<32x128xf32, #tpu.memory_space<vmem>>, vector<32x128xf32>,
    } else {
    }
    return
  }
  func.func @transform_0(%arg0: i32, %arg1: i32) -> (i32, i32) {
    %c0_i32 = arith.constant 0 : i32
    %c0_i32_0 = arith.constant 0 : i32
    return %arg0, %c0_i32 : i32, i32
  }
  func.func @transform_1(%arg0: i32, %arg1: i32) -> (i32, i32) {
    %c0_i32 = arith.constant 0 : i32
    %c0_i32_0 = arith.constant 0 : i32
    %c0_i32_1 = arith.constant 0 : i32
    return %c0_i32, %c0_i32_0 : i32, i32
  }
  func.func @transform_2(%arg0: i32, %arg1: i32) -> (i32, i32) {
    %c0_i32 = arith.constant 0 : i32
    %c0_i32_0 = arith.constant 0 : i32
    return %arg0, %c0_i32 : i32, i32
  }
  func.func @transform_3(%arg0: i32, %arg1: i32) -> (i32, i32, i32) {
    %c0_i32 = arith.constant 0 : i32
    %c0_i32_0 = arith.constant 0 : i32
    %c0_i32_1 = arith.constant 0 : i32
    return %arg1, %c0_i32, %c0_i32_0 : i32, i32, i32
  }
  func.func @transform_4(%arg0: i32, %arg1: i32) -> (i32, i32, i32) {
    %c0_i32 = arith.constant 0 : i32
    %c0_i32_0 = arith.constant 0 : i32
    %c0_i32_1 = arith.constant 0 : i32
    return %arg1, %c0_i32, %c0_i32_0 : i32, i32, i32
  }
  func.func @transform_5(%arg0: i32, %arg1: i32) -> (i32, i32, i32, i32) {
    %c0_i32 = arith.constant 0 : i32
    %c0_i32_0 = arith.constant 0 : i32
    %c0_i32_1 = arith.constant 0 : i32
    %c0_i32_2 = arith.constant 0 : i32
    return %arg1, %c0_i32, %c0_i32_0, %c0_i32_1 : i32, i32, i32, i32
  }
  func.func @transform_6(%arg0: i32, %arg1: i32) -> (i32, i32, i32, i32) {
    %c0_i32 = arith.constant 0 : i32
    %c0_i32_0 = arith.constant 0 : i32
    %c0_i32_1 = arith.constant 0 : i32
    %c0_i32_2 = arith.constant 0 : i32
    return %arg1, %c0_i32, %c0_i32_0, %c0_i32_1 : i32, i32, i32, i32
  }
  func.func @transform_7(%arg0: i32, %arg1: i32) -> (i32, i32, i32, i32) {
    %c0_i32 = arith.constant 0 : i32
    %c0_i32_0 = arith.constant 0 : i32
    %c0_i32_1 = arith.constant 0 : i32
    %c0_i32_2 = arith.constant 0 : i32
    return %arg1, %c0_i32, %c0_i32_0, %c0_i32_1 : i32, i32, i32, i32
  }
  func.func @transform_8(%arg0: i32, %arg1: i32) -> (i32, i32, i32, i32) {
    %c0_i32 = arith.constant 0 : i32
    %c0_i32_0 = arith.constant 0 : i32
    %c0_i32_1 = arith.constant 0 : i32
    %c0_i32_2 = arith.constant 0 : i32
    return %arg1, %c0_i32, %c0_i32_0, %c0_i32_1 : i32, i32, i32, i32
  }
  func.func @transform_9(%arg0: i32, %arg1: i32) -> (i32, i32, i32, i32) {
    %c0_i32 = arith.constant 0 : i32
    %c0_i32_0 = arith.constant 0 : i32
    %c0_i32_1 = arith.constant 0 : i32
    %c0_i32_2 = arith.constant 0 : i32
    return %arg1, %c0_i32, %c0_i32_0, %c0_i32_1 : i32, i32, i32, i32
  }
  func.func @transform_10(%arg0: i32, %arg1: i32) -> (i32, i32, i32, i32) {
    %c0_i32 = arith.constant 0 : i32
    %c0_i32_0 = arith.constant 0 : i32
    %c0_i32_1 = arith.constant 0 : i32
    %c0_i32_2 = arith.constant 0 : i32
    return %arg1, %c0_i32, %c0_i32_0, %c0_i32_1 : i32, i32, i32, i32
  }
  func.func @transform_11(%arg0: i32, %arg1: i32) -> (i32, i32, i32, i32) {
    %c0_i32 = arith.constant 0 : i32
    %c0_i32_0 = arith.constant 0 : i32
    %c0_i32_1 = arith.constant 0 : i32
    %c0_i32_2 = arith.constant 0 : i32
    return %arg1, %c0_i32, %c0_i32_0, %c0_i32_1 : i32, i32, i32, i32
  }
  func.func @transform_12(%arg0: i32, %arg1: i32) -> (i32, i32, i32) {
    %c0_i32 = arith.constant 0 : i32
    %c0_i32_0 = arith.constant 0 : i32
    %c0_i32_1 = arith.constant 0 : i32
    return %arg1, %c0_i32, %c0_i32_0 : i32, i32, i32
  }
  func.func @transform_13(%arg0: i32, %arg1: i32) -> (i32, i32, i32) {
    %c0_i32 = arith.constant 0 : i32
    %c0_i32_0 = arith.constant 0 : i32
    %c0_i32_1 = arith.constant 0 : i32
    return %arg1, %c0_i32, %c0_i32_0 : i32, i32, i32
  }
  func.func @transform_14(%arg0: i32, %arg1: i32) -> (i32, i32, i32) {
    %c0_i32 = arith.constant 0 : i32
    %c0_i32_0 = arith.constant 0 : i32
    %c0_i32_1 = arith.constant 0 : i32
    return %arg1, %c0_i32, %c0_i32_0 : i32, i32, i32
  }
  func.func @transform_15(%arg0: i32, %arg1: i32) -> (i32, i32, i32) {
    %c0_i32 = arith.constant 0 : i32
    %c0_i32_0 = arith.constant 0 : i32
    %c0_i32_1 = arith.constant 0 : i32
    return %arg1, %c0_i32, %c0_i32_0 : i32, i32, i32
  }
  func.func @transform_16(%arg0: i32, %arg1: i32) -> (i32, i32, i32) {
    %c0_i32 = arith.constant 0 : i32
    %c0_i32_0 = arith.constant 0 : i32
    %c0_i32_1 = arith.constant 0 : i32
    return %arg1, %c0_i32, %c0_i32_0 : i32, i32, i32
  }
  func.func @transform_17(%arg0: i32, %arg1: i32) -> (i32, i32, i32) {
    %c0_i32 = arith.constant 0 : i32
    %c0_i32_0 = arith.constant 0 : i32
    %c0_i32_1 = arith.constant 0 : i32
    return %arg1, %c0_i32, %c0_i32_0 : i32, i32, i32
  }
  func.func @transform_18(%arg0: i32, %arg1: i32) -> (i32, i32, i32) {
    %c0_i32 = arith.constant 0 : i32
    %c0_i32_0 = arith.constant 0 : i32
    %c0_i32_1 = arith.constant 0 : i32
    return %arg1, %c0_i32, %c0_i32_0 : i32, i32, i32
  }
  func.func @transform_19(%arg0: i32, %arg1: i32) -> (i32, i32) {
    %c0_i32 = arith.constant 0 : i32
    %c0_i32_0 = arith.constant 0 : i32
    %c0_i32_1 = arith.constant 0 : i32
    return %c0_i32, %c0_i32_0 : i32, i32
  }
  func.func @transform_20(%arg0: i32, %arg1: i32) -> (i32, i32) {
    %c0_i32 = arith.constant 0 : i32
    %c0_i32_0 = arith.constant 0 : i32
    %c0_i32_1 = arith.constant 0 : i32
    return %c0_i32, %c0_i32_0 : i32, i32
  }
  func.func @transform_21(%arg0: i32, %arg1: i32) -> (i32, i32) {
    %c0_i32 = arith.constant 0 : i32
    %c0_i32_0 = arith.constant 0 : i32
    return %arg0, %c0_i32 : i32, i32
  }
}

</mosaic_0001>

<bundles_post_ra>
// kernel: gigapath_forward.1
= control target key start
LH: loop header
LB: loop body
LE: loop exit
PB: predicated region body
PF: predicated region fallthrough
CT: control target
= control target key end

     0   :  { %s4699_s25 = smov 0   ;;  %s4701_s26 = smov 0   ;;  %s5438_s0 = inlined_call_operand.vmem [shape: bf16[64,192], index: 0, kind: input, shape index: {}]   ;;  %s5439_s1 = inlined_call_operand.vmem [shape: bf16[192,128], index: 1, kind: input, shape index: {}]   ;;  %s5440_s2 = inlined_call_operand.vmem [shape: f32[64,128], index: 2, kind: input, shape index: {}]   ;;  %s5441_s3 = inlined_call_operand.vmem [shape: f32[2,1,128], index: 3, kind: input, shape index: {}]   ;;  %s5442_s4 = inlined_call_operand.vmem [shape: f32[2,1,128], index: 4, kind: input, shape index: {}]   ;;  %s5443_s5 = inlined_call_operand.vmem [shape: bf16[2,2,128,64], index: 5, kind: input, shape index: {}]   ;;  %s5444_s6 = inlined_call_operand.vmem [shape: bf16[2,2,128,64], index: 6, kind: input, shape index: {}]   ;;  %s5445_s7 = inlined_call_operand.vmem [shape: bf16[2,2,128,64], index: 7, kind: input, shape index: {}]   ;;  %s5446_s8 = inlined_call_operand.vmem [shape: f32[2,2,1,64], index: 8, kind: input, shape index: {}]   ;;  %s5447_s9 = inlined_call_operand.vmem [shape: f32[2,2,1,64], index: 9, kind: input, shape index: {}]   ;;  %s5448_s10 = inlined_call_operand.vmem [shape: f32[2,2,1,64], index: 10, kind: input, shape index: {}]   ;;  %s5449_s11 = inlined_call_operand.vmem [shape: bf16[2,2,64,128], index: 11, kind: input, shape index: {}]   ;;  %s5450_s12 = inlined_call_operand.vmem [shape: f32[2,1,128], index: 12, kind: input, shape index: {}]   ;;  %s5451_s13 = inlined_call_operand.vmem [shape: f32[2,1,128], index: 13, kind: input, shape index: {}]   ;;  %s5452_s14 = inlined_call_operand.vmem [shape: f32[2,1,128], index: 14, kind: input, shape index: {}]   ;;  %s5453_s15 = inlined_call_operand.vmem [shape: bf16[2,128,512], index: 15, kind: input, shape index: {}]   ;;  %s5454_s16 = inlined_call_operand.vmem [shape: f32[2,1,512], index: 16, kind: input, shape index: {}]   ;;  %s5455_s17 = inlined_call_operand.vmem [shape: bf16[2,512,128], index: 17, kind: input, shape index: {}]   ;;  %s5456_s18 = inlined_call_operand.vmem [shape: f32[2,1,128], index: 18, kind: input, shape index: {}]   ;;  %s5457_s19 = inlined_call_operand.vmem [shape: f32[1,128], index: 19, kind: input, shape index: {}]   ;;  %s5458_s20 = inlined_call_operand.vmem [shape: f32[1,128], index: 20, kind: input, shape index: {}]   ;;  %s5459_s21 = inlined_call_operand.vmem [shape: f32[64,128], index: 21, kind: output, shape index: {}]  }
   0x1   :  { %5468 = sst [smem:[#allocation12_spill]] %s5438_s0  ;;  %s4703_s27 = smov 0  }
   0x2   :  { %5469 = sst [smem:[#allocation13_spill]] %s5439_s1 }
   0x3   :  { %5470 = sst [smem:[#allocation14_spill]] %s5440_s2  ;;  %s4697_s2 = smov 0  }
   0x4   :  { %5471 = sst [smem:[#allocation15_spill]] %s5441_s3  ;;  %s4705_s3 = smov 0  }
   0x5   :  { %5472 = sst [smem:[#allocation16_spill]] %s5442_s4 }
   0x6   :  { %5473 = sst [smem:[#allocation17_spill]] %s5443_s5 }
   0x7   :  { %5474 = sst [smem:[#allocation18_spill]] %s5444_s6 }
   0x8   :  { %5475 = sst [smem:[#allocation19_spill]] %s5445_s7 }
   0x9   :  { %5476 = sst [smem:[#allocation20_spill]] %s5446_s8 }
   0xa   :  { %5477 = sst [smem:[#allocation21_spill]] %s5447_s9 }
   0xb   :  { %5478 = sst [smem:[#allocation22_spill]] %s5448_s10 }
   0xc   :  { %5479 = sst [smem:[#allocation23_spill]] %s5449_s11 }
   0xd   :  { %5480 = sst [smem:[#allocation24_spill]] %s5452_s14 }
   0xe   :  { %5481 = sst [smem:[#allocation25_spill]] %s5453_s15 }
   0xf   :  { %5482 = sst [smem:[#allocation26_spill]] %s5454_s16 }
  0x10   :  { %5483 = sst [smem:[#allocation27_spill]] %s5456_s18 }
  0x11   :  { %5484 = sst [smem:[#allocation28_spill]] %s5457_s19 }
  0x12   :  { %5485 = sst [smem:[#allocation29_spill]] %s5458_s20 }
  0x13   :  { %5486 = sst [smem:[#allocation30_spill]] %s5459_s21 }
  0x14 LB: > { %5487 = sst [smem:[#allocation3_spill]] %s4568_s2  ;;  %s40_s28 = sadd.s32 1, %s4576_s26  ;;  %s4584_s3 = sphi %s4705_s3, %s31_s3   ;;  %s4580_s27 = sphi %s4703_s27, %s5534_s27   ;;  %s4576_s26 = sphi %s4701_s26, %s5533_s26   ;;  %s4572_s25 = sphi %s4699_s25, %s5532_s25   ;;  %s4568_s2 = sphi %s4697_s2, %s5531_s2  }
  0x15   : > { %5488 = sst [smem:[#allocation4_spill]] %s4576_s26  ;;  %s43_s29 = sadd.s32 1, %s4580_s27 }
  0x16   : > { %5489 = sst [smem:[#allocation5_spill]] %s4580_s27  ;;  %p41_p0 = scmp.ge.s32.totalorder %s40_s28, 2 }
  0x17   : > { %5490 = sst [smem:[#allocation6_spill]] %s4584_s3  ;;  %p3593_p1 = scmp.ge.s32.totalorder %s4584_s3, 1 }
  0x18   : > { %p756_p2 = scmp.lt.s32.totalorder %s4584_s3, 5  ;;  %s5536_s28 = smov (%p41_p0, %s40_s28), 0 }
  0x19   : > { %5491 = sst [smem:[#allocation7_spill]] %s5536_s28  ;;  %s5538_s29 = smov (!%p41_p0, %s43_s29), %s4580_s27 }
  0x1a   : > { %p757_p3 = pnand %p3593_p1, %p756_p2  ;;  %p45_p4 = scmp.ge.s32.totalorder %s5538_s29, 2 }
  0x1c   : > { %s5540_s29 = smov (%p45_p4, %s5538_s29), 0  ;;  %760 = sbr.rel (%p757_p3) target bundleno = 2777 (0xad9), region = 104 }
  0x1d   : > { %5492 = sst [smem:[#allocation8_spill]] %s5540_s29 }
  0x21   : > { %s3594_s0 = sshll.u32 %s4572_s25, 2  ;;  %p899_p5 = scmp.lt.s32.totalorder %s4568_s2, 1 }
  0x22   : > { %p887_p6 = scmp.lt.s32.totalorder %s3594_s0, 7  ;;  %s5495_s20 = sld [smem:[#allocation12_spill]] }
  0x23   : > { %s4731_s4 = scalar_select %p899_p5, %s4568_s2, 1 }
  0x24   : > { %s5542_s0 = smov (!%p887_p6, %s3594_s0), 7  ;;  %s5496_s30 = sld [smem:[#allocation14_spill]] }
  0x25   : > { %s4246_s28 = sshll.u32 %s5542_s0, 3  ;;  %s4247_s27 = sshll.u32 %s4731_s4, 7 }
  0x26   : > { %s5497_s1 = sld [smem:[#allocation17_spill]]  ;;  %s3605_s3 = sshll.u32 %s4731_s4, 1 }
  0x27   : > { %s5498_s6 = sld [smem:[#allocation18_spill]]  ;;  %s4250_s18 = sshll.u32 %s4731_s4, 6 }
  0x28   : > { %s4745_s19 = scalar_lea.vmem %s5495_s20, %s4246_s28  ;;  %s5499_s7 = sld [smem:[#allocation19_spill]] }
  0x29   : > { %s5501_s8 = sld [smem:[#allocation20_spill]]  ;;  %s3612_s0 = sshll.u32 %s4731_s4, 2 }
  0x2a   : > { %s4750_s5 = scalar_lea.vmem %s5496_s30, %s4246_s28  ;;  %s5503_s9 = sld [smem:[#allocation21_spill]] }
  0x2b   : > { %s5504_s10 = sld [smem:[#allocation22_spill]] }
  0x2c   : > { %s4755_s24 = scalar_lea.vmem %s5497_s1, %s4247_s27  ;;  %s5506_s11 = sld [smem:[#allocation23_spill]] }
  0x2d   : > { %s4760_s29 = scalar_lea.vmem %s5498_s6, %s4247_s27  ;;  %s5508_s15 = sld [smem:[#allocation25_spill]] }
  0x2e   : > { %s4765_s20 = scalar_lea.vmem %s5499_s7, %s4247_s27  ;;  %s5509_s16 = sld [smem:[#allocation26_spill]] }
  0x2f   : > { %5500 = sst [smem:[#allocation9_spill]] %s4765_s20  ;;  %s4771_s30 = scalar_lea.vmem %s5501_s8, %s3605_s3 }
  0x30   : > { %5502 = sst [smem:[#allocation10_spill]] %s4771_s30  ;;  %s4776_s1 = scalar_lea.vmem %s5503_s9, %s3605_s3 }
  0x31   : > { %s4781_s6 = scalar_lea.vmem %s5504_s10, %s3605_s3  ;;  %s4251_s3 = sshll.u32 %s4731_s4, 8 }
  0x32   : > { %5505 = sst [smem:[#allocation11_spill]] %s4781_s6  ;;  %s4787_s7 = scalar_lea.vmem %s5506_s11, %s4250_s18 }
  0x33   : > { %s4806_s26 = scalar_lea.vmem %s5508_s15, %s4251_s3  ;;  %s4816_s8 = scalar_lea.vmem %s5455_s17, %s4251_s3 }
  0x34   : > { %s4811_s20 = scalar_lea.vmem %s5509_s16, %s3612_s0  ;;  %s5510_s22 = sld [smem:[#allocation27_spill]] }
  0x35   : > { %s5511_s14 = sld [smem:[#allocation30_spill]] }
  0x36   : > { %s5512_s10 = sld [smem:[#allocation3_spill]] }
  0x3a   : > { %s962_s25 = scalar_lea.vmem %s5510_s22, %s4731_s4 }
  0x3b   : > { %s4825_s6 = scalar_lea.vmem %s5511_s14, %s4246_s28 }
  0x3c   : > { %p3617_p7 = scmp.ne.s32.totalorder %s5512_s10, 0 }
  0x3d   : > { %s5513_s27 = sld [smem:[#allocation13_spill]] (!%p3617_p7) }
  0x3e   : > { %973 = sbr.rel (%p3617_p7) target bundleno = 245 (0xf5), region = 108 }
  0x43   : > { %s5514_s15 = smov %s5513_s27  ;;  %v4264_v0 = vld [vmem:[%s5513_s27 + $0x38] sm:$0xff]  ;;  %v4253_v8 = vld [vmem:[%s4745_s19 + $0x4] sm:$0xf]  ;;  %v3622_v9 = vld [vmem:[%s4745_s19 + $0x8] sm:$0xf0]  ;;  %vm1096_vm0 = vcmask 523264  }
  0x44   : > { %v4268_v1 = vld [vmem:[%s5514_s15 + $0x58] sm:$0xff]  ;;  %1103 = vmatpush.bf16.msra.mxu0 %v4264_v0  ;;  %4389 = vmatpush.bf16.msra.mxu2 %v4264_v0  ;;  %v4263_v2 = vld [vmem:[%s5514_s15 + $0x30] sm:$0xff]  ;;  %v4262_v4 = vld [vmem:[%s5514_s15 + $0x28] sm:$0xff]  ;;  %v3625_v10 = vor.u32 %v4253_v8, %v3622_v9 }
  0x45   : > { %1126 = vmatpush.bf16.msra.mxu1 %v4268_v1  ;;  %v4267_v3 = vld [vmem:[%s5514_s15 + $0x50] sm:$0xff]  ;;  %v4266_v5 = vld [vmem:[%s5514_s15 + $0x48] sm:$0xff]  ;;  %v4261_v6 = vld [vmem:[%s5514_s15 + $0x20] sm:$0xff] }
  0x46   : > { %v4265_v7 = vld [vmem:[%s5514_s15 + $0x40] sm:$0xff]  ;;  %v4260_v11 = vld [vmem:[%s5514_s15 + $0x18] sm:$0xff]  ;;  %v4259_v12 = vld [vmem:[%s5514_s15 + $0x10] sm:$0xff] }
  0x47   : > { %v4258_v13 = vld [vmem:[%s5514_s15 + $0x8] sm:$0xff]  ;;  %v4257_v14 = vld [vmem:[%s5514_s15] sm:$0xff]  ;;  %v3628_v17 = vld [vmem:[%s4745_s19 + $0x10] sm:$0xf] }
  0x48   : > { %1104 = vmatpush.bf16.msra.mxu0 %v4263_v2  ;;  %4390 = vmatpush.bf16.msra.mxu2 %v4263_v2  ;;  %v3620_v15 = vld [vmem:[%s4745_s19] sm:$0xf]  ;;  %v4254_v16 = vld [vmem:[%s4745_s19 + $0x4] sm:$0xf0]  ;;  %v4256_v18 = vld [vmem:[%s4745_s19 + $0x14] sm:$0xf0] }
  0x49   : > { %1127 = vmatpush.bf16.msra.mxu1 %v4267_v3  ;;  %v4255_v19 = vld [vmem:[%s4745_s19 + $0x14] sm:$0xf]  ;;  %v3630_v20 = vld [vmem:[%s4745_s19 + $0x18] sm:$0xf0]  ;;  %v3621_v21 = vor.u32 %v4254_v16, %v3620_v15  ;;  %v3629_v22 = vor.u32 %v4256_v18, %v3628_v17  ;;  %v1002_v26 = vld [vmem:[%s4750_s5] sm:$0xff] }
  0x4a   : > { %v3633_v23 = vor.u32 %v4255_v19, %v3630_v20  ;;  %v1004_v30 = vld [vmem:[%s4750_s5 + $0x10] sm:$0xff]  ;;  %v1003_v31 = vld [vmem:[%s4750_s5 + $0x8] sm:$0xff]  ;;  %v1005_v39 = vld [vmem:[%s4750_s5 + $0x18] sm:$0xff] }
  0x4c   : > { %1105 = vmatpush.bf16.msra.mxu0 %v4262_v4  ;;  %4391 = vmatpush.bf16.msra.mxu2 %v4262_v4 }
  0x4d   : > { %1128 = vmatpush.bf16.msra.mxu1 %v4266_v5 }
  0x50   : > { %1106 = vmatpush.bf16.msra.mxu0 %v4261_v6  ;;  %4392 = vmatpush.bf16.msra.mxu2 %v4261_v6 }
  0x51   : > { %1129 = vmatpush.bf16.msra.mxu1 %v4265_v7 }
  0x54   : > { %3682 = vmatmul.msk.bf16.vlgmr.msra.gmra.mxu1 %vm1096_vm0, %v3625_v10  ;;  %1107 = vmatpush.bf16.msra.mxu0 %v4260_v11 }
  0x55   : > { %4393 = vmatpush.bf16.msra.mxu2 %v4260_v11 }
  0x58   : > { %1108 = vmatpush.bf16.msra.mxu0 %v4259_v12 }
  0x59   : > { %4394 = vmatpush.bf16.msra.mxu2 %v4259_v12 }
  0x5c   : > { %1109 = vmatpush.bf16.msra.mxu0 %v4258_v13 }
  0x5d   : > { %4395 = vmatpush.bf16.msra.mxu2 %v4258_v13 }
  0x60   : > { %1110 = vmatpush.bf16.msra.mxu0 %v4257_v14 }
  0x61   : > { %4396 = vmatpush.bf16.msra.mxu2 %v4257_v14 }
  0x63   : > { %1111 = vmatmul.bf16.vlgmr.msra.gmra.mxu0 %v3621_v21 }
  0x64   : > { %1116 = vmatmul.bf16.vlgmr.msra.gmra.mxu2 %v3629_v22  ;;  %3683 = vmatmul.msk.bf16.gmra.mxu1 %vm1096_vm0, %v3633_v23 }
  0xd1   : > { %v1131_v24 = vpop.f32.mrf.mxu1 }
  0xd9   : > { %v1133_v25 = vpop.f32.mrf.mxu1 }
  0xe0   : > { %v1112_v27 = vpop.f32.mrf.mxu0 }
  0xe1   : > { %v1113_v28 = vadd.f32 %v1112_v27, %v1002_v26  ;;  %v1136_v32 = vpop.f32.mrf.mxu1 }
  0xe3   : > { %v1132_v29 = vadd.f32 %v1131_v24, %v1113_v28 }
  0xe5   : > { %1141 = vst [vmem:[#allocation2 + $0x10] sm:$0xff] %v1132_v29 }
  0xe7   : > { %v1117_v33 = vpop.f32.mrf.mxu2 }
  0xe8   : > { %v1118_v34 = vadd.f32 %v1117_v33, %v1004_v30  ;;  %v1114_v35 = vpop.f32.mrf.mxu0 }
  0xe9   : > { %v1115_v36 = vadd.f32 %v1114_v35, %v1003_v31  ;;  %v1138_v42 = vpop.f32.mrf.mxu1 }
  0xea   : > { %v1137_v37 = vadd.f32 %v1136_v32, %v1118_v34 }
  0xeb   : > { %v1134_v38 = vadd.f32 %v1133_v25, %v1115_v36 }
  0xec   : > { %1143 = vst [vmem:[#allocation2 + $0x18] sm:$0xff] %v1137_v37 }
  0xed   : > { %1142 = vst [vmem:[#allocation2] sm:$0xff] %v1134_v38 }
  0xef   : > { %v1119_v40 = vpop.f32.mrf.mxu2 }
  0xf0   : > { %v1120_v41 = vadd.f32 %v1119_v40, %v1005_v39 }
  0xf2   : > { %v1139_v43 = vadd.f32 %v1138_v42, %v1120_v41 }
  0xf4   : > { %1144 = vst [vmem:[#allocation2 + $0x8] sm:$0xff] %v1139_v43 }
  0xf5 PF: > { %v1147_v44 = vld [vmem:[#allocation2 + $0x18] sm:$0xff]  ;;  %v1145_v45 = vld [vmem:[#allocation2 + $0x10] sm:$0xff]  ;;  %v1146_v46 = vld [vmem:[#allocation2] sm:$0xff]  ;;  %v4586_v48 = vmov 128.0   ;;  %s5515_s19 = sld [smem:[#allocation9_spill]]  ;;  %vm1534_vm14 = vcmask 523264   ;;  %s5523_s2 = scalar_lea.vmem %s5451_s13, %s4731_s4 }
  0xf6   : > { %1158 = vadd.xlane.f32.xlu2 %v1147_v44  ;;  %1154 = vadd.xlane.f32.xlu0 %v1145_v45  ;;  %4450 = vrcp.f32 %v4586_v48  ;;  %v4276_v7 = vld [vmem:[%s4755_s24 + $0x38] sm:$0xff]  ;;  %v4275_v10 = vld [vmem:[%s4755_s24 + $0x30] sm:$0xff]  ;;  %v4274_v13 = vld [vmem:[%s4755_s24 + $0x28] sm:$0xff]  ;;  %s5516_s16 = sld [smem:[#allocation15_spill]]  ;;  %vm1667_vm15 = vcmask 1043456  }
  0xf7   : > { %v4284_v8 = vld [vmem:[%s4760_s29 + $0x38] sm:$0xff]  ;;  %1325 = vmatpush.bf16.msra.mxu0 %v4276_v7  ;;  %v4283_v11 = vld [vmem:[%s4760_s29 + $0x30] sm:$0xff]  ;;  %v4282_v14 = vld [vmem:[%s4760_s29 + $0x28] sm:$0xff]  ;;  %s5518_s10 = sld [smem:[#allocation16_spill]] }
  0xf8   : > { %1416 = vmatpush.bf16.msra.mxu1 %v4284_v8  ;;  %v4273_v16 = vld [vmem:[%s4755_s24 + $0x20] sm:$0xff]  ;;  %v4272_v19 = vld [vmem:[%s4755_s24 + $0x18] sm:$0xff]  ;;  %v4271_v22 = vld [vmem:[%s4755_s24 + $0x10] sm:$0xff]  ;;  %s5520_s0 = sld [smem:[#allocation10_spill]] }
  0xf9   : > { %v4281_v17 = vld [vmem:[%s4760_s29 + $0x20] sm:$0xff]  ;;  %v4280_v20 = vld [vmem:[%s4760_s29 + $0x18] sm:$0xff]  ;;  %v4279_v23 = vld [vmem:[%s4760_s29 + $0x10] sm:$0xff]  ;;  %s5521_s27 = sld [smem:[#allocation11_spill]] }
  0xfa   : > { %v4270_v25 = vld [vmem:[%s4755_s24 + $0x8] sm:$0xff]  ;;  %v4269_v33 = vld [vmem:[%s4755_s24] sm:$0xff]  ;;  %s5524_s11 = sld [smem:[#allocation24_spill]] }
  0xfb   : > { %v1148_v47 = vld [vmem:[#allocation2 + $0x8] sm:$0xff]  ;;  %v4292_v9 = vld [vmem:[%s5515_s19 + $0x38] sm:$0xff]  ;;  %v4291_v12 = vld [vmem:[%s5515_s19 + $0x30] sm:$0xff]  ;;  %1326 = vmatpush.bf16.msra.mxu0 %v4275_v10 }
  0xfc   : > { %v4451_v49 = vpop.eup %4450  ;;  %1503 = vmatpush.bf16.msra.mxu2 %v4292_v9  ;;  %1417 = vmatpush.bf16.msra.mxu1 %v4283_v11  ;;  %v4290_v15 = vld [vmem:[%s5515_s19 + $0x28] sm:$0xff]  ;;  %v4289_v18 = vld [vmem:[%s5515_s19 + $0x20] sm:$0xff]  ;;  %v4288_v21 = vld [vmem:[%s5515_s19 + $0x18] sm:$0xff]  ;;  %s5517_s30 = scalar_lea.vmem %s5516_s16, %s4731_s4 }
  0xfd   : > { %v1163_v50 = vmul.f32 128.0, %v4451_v49  ;;  %vm1167_vm1 = vweird.f32 %v4451_v49  ;;  %v4287_v24 = vld [vmem:[%s5515_s19 + $0x10] sm:$0xff]  ;;  %v4278_v26 = vld [vmem:[%s4760_s29 + $0x8] sm:$0xff]  ;;  %v4277_v34 = vld [vmem:[%s4760_s29] sm:$0xff]  ;;  %s5519_s18 = scalar_lea.vmem %s5518_s10, %s4731_s4 }
  0xfe   : > { %1156 = vadd.xlane.f32.xlu0 %v1146_v46  ;;  %1160 = vadd.xlane.f32.xlu2 %v1148_v47  ;;  %v4286_v27 = vld [vmem:[%s5515_s19 + $0x8] sm:$0xff]  ;;  %v4285_v35 = vld [vmem:[%s5515_s19] sm:$0xff] }
  0xff   : > { %v1164_v51 = vsub.f32 1.0, %v1163_v50  ;;  %1327 = vmatpush.bf16.msra.mxu0 %v4274_v13  ;;  %v4439_v7 = vld [vmem:[%s5519_s18] ss:$0 sm:$0xff] }
 0x100   : > { %1504 = vmatpush.bf16.msra.mxu2 %v4291_v12  ;;  %1418 = vmatpush.bf16.msra.mxu1 %v4282_v14  ;;  %s5525_s14 = scalar_lea.vmem %s5524_s11, %s4731_s4 }
 0x101   : > { %v1165_v52 = vmul.f32 %v4451_v49, %v1164_v51 }
 0x103   : > { %v1166_v53 = vadd.f32 %v4451_v49, %v1165_v52  ;;  %1328 = vmatpush.bf16.msra.mxu0 %v4273_v16 }
 0x104   : > { %1505 = vmatpush.bf16.msra.mxu2 %v4290_v15  ;;  %1419 = vmatpush.bf16.msra.mxu1 %v4281_v17 }
 0x105   : > { %v4878_v54 = vsel %vm1167_vm1, %v4451_v49, %v1166_v53  ;;  %vm1615_vm1 = vcmask 64512  }
 0x107   : > { %1329 = vmatpush.bf16.msra.mxu0 %v4272_v19 }
 0x108   : > { %1506 = vmatpush.bf16.msra.mxu2 %v4289_v18  ;;  %1420 = vmatpush.bf16.msra.mxu1 %v4280_v20 }
 0x10b   : > { %1330 = vmatpush.bf16.msra.mxu0 %v4271_v22 }
 0x10c   : > { %1507 = vmatpush.bf16.msra.mxu2 %v4288_v21  ;;  %1421 = vmatpush.bf16.msra.mxu1 %v4279_v23 }
 0x10f   : > { %1331 = vmatpush.bf16.msra.mxu0 %v4270_v25 }
 0x110   : > { %1508 = vmatpush.bf16.msra.mxu2 %v4287_v24  ;;  %1422 = vmatpush.bf16.msra.mxu1 %v4278_v26  ;;  %v4441_v26 = vld [vmem:[%s4776_s1] ss:$0 sm:$0xff] }
 0x113   : > { %1332 = vmatpush.bf16.msra.mxu0 %v4269_v33 }
 0x114   : > { %1509 = vmatpush.bf16.msra.mxu2 %v4286_v27  ;;  %1423 = vmatpush.bf16.msra.mxu1 %v4277_v34  ;;  %v4440_v27 = vld [vmem:[%s5520_s0] ss:$0 sm:$0xff] }
 0x118   : > { %1510 = vmatpush.bf16.msra.mxu2 %v4285_v35 }
 0x169   : > { %v1159_v55 = vpop.xlane.xlu2 %1158  ;;  %v1155_v56 = vpop.xlane.xlu0 %1154 }
 0x16a   : > { %v1171_v57 = vmul.f32 %v4878_v54, %v1159_v55  ;;  %v1169_v58 = vmul.f32 %v4878_v54, %v1155_v56 }
 0x16c   : > { %v4882_v59 = vsub.f32 %v1147_v44, %v1171_v57  ;;  %v4884_v60 = vsub.f32 %v1145_v45, %v1169_v58 }
 0x16e   : > { %v1179_v61 = vmul.f32 %v4882_v59, %v4882_v59  ;;  %v1177_v62 = vmul.f32 %v4884_v60, %v4884_v60 }
 0x170   : > { %1185 = vadd.xlane.f32.xlu0 %v1179_v61  ;;  %1181 = vadd.xlane.f32.xlu1 %v1177_v62  ;;  %v4438_v62 = vld [vmem:[%s5517_s30] ss:$0 sm:$0xff] }
 0x171   : > { %v1157_v63 = vpop.xlane.xlu0 %1156  ;;  %v1161_v0 = vpop.xlane.xlu2 %1160 }
 0x172   : > { %v1170_v1 = vmul.f32 %v4878_v54, %v1157_v63  ;;  %v1172_v3 = vmul.f32 %v4878_v54, %v1161_v0 }
 0x174   : > { %v4891_v2 = vsub.f32 %v1146_v46, %v1170_v1  ;;  %v4896_v5 = vsub.f32 %v1148_v47, %v1172_v3 }
 0x176   : > { %v1178_v4 = vmul.f32 %v4891_v2, %v4891_v2  ;;  %v1180_v6 = vmul.f32 %v4896_v5, %v4896_v5 }
 0x178   : > { %1183 = vadd.xlane.f32.xlu1 %v1178_v4 }
 0x180   : > { %1187 = vadd.xlane.f32.xlu1 %v1180_v6 }
 0x1e3   : > { %v1182_v28 = vpop.xlane.xlu1 %1181  ;;  %v1186_v29 = vpop.xlane.xlu0 %1185 }
 0x1e4   : > { %v1189_v30 = vmul.f32 %v1182_v28, %v4878_v54  ;;  %v1191_v32 = vmul.f32 %v1186_v29, %v4878_v54 }
 0x1e6   : > { %v1193_v31 = vadd.f32 1e-06, %v1189_v30  ;;  %v1195_v36 = vadd.f32 1e-06, %v1191_v32 }
 0x1e8   : > { %4452 = vrsqrt.f32 %v1193_v31  ;;  %vm1203_vm3 = vweird.f32 %v1193_v31  ;;  %vm1223_vm10 = vweird.f32 %v1195_v36 }
 0x1e9   : > { %4454 = vrsqrt.f32 %v1195_v36 }
 0x1eb   : > { %v1184_v37 = vpop.xlane.xlu1 %1183 }
 0x1ec   : > { %v1190_v38 = vmul.f32 %v1184_v37, %v4878_v54 }
 0x1ee   : > { %v4453_v39 = vpop.eup %4452  ;;  %v1194_v40 = vadd.f32 1e-06, %v1190_v38 }
 0x1ef   : > { %v1198_v41 = vmul.f32 %v4453_v39, %v1193_v31  ;;  %v4455_v45 = vpop.eup %4454  ;;  %vm1204_vm2 = vweird.f32 %v4453_v39  ;;  %v4442_v31 = vld [vmem:[%s5521_s27] ss:$0 sm:$0xff] }
 0x1f0   : > { %4456 = vrsqrt.f32 %v1194_v40  ;;  %v1218_v51 = vmul.f32 %v4455_v45, %v1195_v36  ;;  %vm1205_vm4 = vmor %vm1203_vm3, %vm1204_vm2  ;;  %vm1213_vm6 = vweird.f32 %v1194_v40  ;;  %vm1224_vm11 = vweird.f32 %v4455_v45 }
 0x1f1   : > { %v1199_v42 = vmul.f32 %v4453_v39, %v1198_v41  ;;  %vm1225_vm13 = vmor %vm1223_vm10, %vm1224_vm11 }
 0x1f2   : > { %v1219_v56 = vmul.f32 %v4455_v45, %v1218_v51 }
 0x1f3   : > { %v1200_v43 = vmul.f32 0.5, %v1199_v42  ;;  %v1188_v44 = vpop.xlane.xlu1 %1187 }
 0x1f4   : > { %v1192_v46 = vmul.f32 %v1188_v44, %v4878_v54  ;;  %v1220_v0 = vmul.f32 0.5, %v1219_v56 }
 0x1f5   : > { %v1201_v47 = vsub.f32 1.5, %v1200_v43 }
 0x1f6   : > { %v4457_v48 = vpop.eup %4456  ;;  %v1196_v49 = vadd.f32 1e-06, %v1192_v46  ;;  %v1221_v10 = vsub.f32 1.5, %v1220_v0 }
 0x1f7   : > { %v1202_v50 = vmul.f32 %v4453_v39, %v1201_v47  ;;  %v1208_v52 = vmul.f32 %v4457_v48, %v1194_v40  ;;  %vm1214_vm5 = vweird.f32 %v4457_v48 }
 0x1f8   : > { %4458 = vrsqrt.f32 %v1196_v49  ;;  %vm1215_vm7 = vmor %vm1213_vm6, %vm1214_vm5  ;;  %vm1233_vm8 = vweird.f32 %v1196_v49  ;;  %v1222_v15 = vmul.f32 %v4455_v45, %v1221_v10 }
 0x1f9   : > { %v1209_v53 = vmul.f32 %v4457_v48, %v1208_v52  ;;  %v1206_v55 = vsel %vm1205_vm4, %v4453_v39, %v1202_v50 }
 0x1fa   : > { %v1237_v63 = vmul.f32 %v1206_v55, %v4884_v60 }
 0x1fb   : > { %v1210_v57 = vmul.f32 0.5, %v1209_v53 }
 0x1fc   : > { %v1244_v8 = vmul.f32 %v4438_v62, %v1237_v63 }
 0x1fd   : > { %v1211_v58 = vsub.f32 1.5, %v1210_v57 }
 0x1fe   : > { %v4459_v61 = vpop.eup %4458  ;;  %v1251_v13 = vadd.f32 %v4439_v7, %v1244_v8 }
 0x1ff   : > { %v1212_v1 = vmul.f32 %v4457_v48, %v1211_v58  ;;  %v1228_v3 = vmul.f32 %v4459_v61, %v1196_v49  ;;  %vm1234_vm9 = vweird.f32 %v4459_v61 }
 0x200   : > { %vm1235_vm12 = vmor %vm1233_vm8, %vm1234_vm9 }
 0x201   : > { %v1216_v4 = vsel %vm1215_vm7, %v4457_v48, %v1212_v1  ;;  %v1229_v6 = vmul.f32 %v4459_v61, %v1228_v3 }
 0x202   : > { %v1238_v9 = vmul.f32 %v1216_v4, %v4891_v2  ;;  %v1226_v2 = vsel %vm1225_vm13, %v4455_v45, %v1222_v15  ;;  %v1149_v15 = vlaneseq }
 0x203   : > { %v1230_v11 = vmul.f32 0.5, %v1229_v6  ;;  %v1239_v20 = vmul.f32 %v1226_v2, %v4882_v59 }
 0x204   : > { %v1245_v60 = vmul.f32 %v4438_v62, %v1238_v9 }
 0x205   : > { %v1231_v12 = vsub.f32 1.5, %v1230_v11  ;;  %v1246_v22 = vmul.f32 %v4438_v62, %v1239_v20 }
 0x206   : > { %v1252_v14 = vadd.f32 %v4439_v7, %v1245_v60 }
 0x207   : > { %v1232_v16 = vmul.f32 %v4459_v61, %v1231_v12  ;;  %v1253_v24 = vadd.f32 %v4439_v7, %v1246_v22 }
 0x208   : > { %v4940_v17 = vpack.c.bf16 %v1252_v14, %v1251_v13 }
 0x209   : > { %v1236_v18 = vsel %vm1235_vm12, %v4459_v61, %v1232_v16  ;;  %v4967_v16 = vand.u32 127, %v1149_v15 }
 0x20a   : > { %1333 = vmatmul.bf16.vlgmr.msra.gmra.mxu0 %v4940_v17  ;;  %1424 = vmatmul.bf16.vlgmr.msra.gmra.mxu1 %v4940_v17  ;;  %v1240_v19 = vmul.f32 %v1236_v18, %v4896_v5 }
 0x20b   : > { %1511 = vmatmul.bf16.vlgmr.msra.gmra.mxu2 %v4940_v17  ;;  %vm1151_vm0 = vcmp.lt.s32.totalorder %v4967_v16, 5 }
 0x20c   : > { %v1247_v21 = vmul.f32 %v4438_v62, %v1240_v19 }
 0x20e   : > { %v1254_v23 = vadd.f32 %v4439_v7, %v1247_v21 }
 0x210   : > { %v4947_v25 = vpack.c.bf16 %v1254_v23, %v1253_v24 }
 0x21a   : > { %1338 = vmatmul.bf16.gmra.mxu0 %v4947_v25  ;;  %1429 = vmatmul.bf16.gmra.mxu1 %v4947_v25 }
 0x21b   : > { %1516 = vmatmul.bf16.gmra.mxu2 %v4947_v25 }
 0x287   : > { %v1334_v28 = vpop.f32.mrf.mxu0  ;;  %v1425_v29 = vpop.f32.mrf.mxu1 }
 0x288   : > { %v1426_v5 = vadd.f32 %v4441_v26, %v1425_v29  ;;  %v1335_v59 = vadd.f32 %v4440_v27, %v1334_v28 }
 0x28a   : > { %v1526_v30 = vpack.c.bf16 %v1426_v5, %v1426_v5  ;;  %v1344_v33 = vmul.f32 0.125, %v1335_v59 }
 0x28c   : > { %v1539_v32 = vsel %vm1534_vm14, %v1526_v30, 0  ;;  %v1522_v39 = vpack.c.bf16 %v1344_v33, %v1344_v33 }
 0x28d   : > { %1548 = vmatpush.bf16.xpose.msra.mxu3 %v1539_v32 }
 0x28e   : > { %v1512_v34 = vpop.f32.mrf.mxu2 }
 0x28f   : > { %v1513_v35 = vadd.f32 %v4442_v31, %v1512_v34  ;;  %v1427_v36 = vpop.f32.mrf.mxu1  ;;  %v1336_v44 = vpop.f32.mrf.mxu0 }
 0x290   : > { %v1428_v37 = vadd.f32 %v4441_v26, %v1427_v36  ;;  %v1337_v49 = vadd.f32 %v4440_v27, %v1336_v44 }
 0x291   : > { %v1530_v38 = vpack.c.bf16 %v1513_v35, %v1513_v35 }
 0x292   : > { %v1527_v40 = vpack.c.bf16 %v1428_v37, %v1428_v37  ;;  %v1345_v53 = vmul.f32 0.125, %v1337_v49  ;;  %v4302_v49 = vld [vmem:[%s4755_s24 + $0x68] sm:$0xff] }
 0x293   : > { %v1669_v41 = vsel %vm1667_vm15, %v1530_v38, 0 }
 0x294   : > { %1678 = vmatpush.bf16.msrb.mxu0 %v1669_v41  ;;  %3780 = vmatmul.msk.bf16.vlgmr.msra.gmra.mxu3 %vm1534_vm14, %v1522_v39  ;;  %v1558_v42 = vsel %vm1534_vm14, %v1527_v40, 0  ;;  %v1523_v62 = vpack.c.bf16 %v1345_v53, %v1345_v53  ;;  %v4299_v53 = vld [vmem:[%s4755_s24 + $0x50] sm:$0xff] }
 0x295   : > { %1567 = vmatpush.bf16.xpose.msrb.mxu3 %v1558_v42  ;;  %v4304_v42 = vld [vmem:[%s4755_s24 + $0x78] sm:$0xff] }
 0x296   : > { %v1514_v43 = vpop.f32.mrf.mxu2 }
 0x297   : > { %v1515_v45 = vadd.f32 %v4442_v31, %v1514_v43  ;;  %v1430_v46 = vpop.f32.mrf.mxu1  ;;  %v1339_v3 = vpop.f32.mrf.mxu0 }
 0x298   : > { %v1431_v47 = vadd.f32 %v4441_v26, %v1430_v46  ;;  %v1340_v6 = vadd.f32 %v4440_v27, %v1339_v3  ;;  %1821 = vmatpush.bf16.msra.mxu0 %v4304_v42  ;;  %v4305_v3 = vld [vmem:[%s4760_s29 + $0x40] sm:$0xff] }
 0x299   : > { %v1531_v48 = vpack.c.bf16 %v1515_v45, %v1515_v45 }
 0x29a   : > { %v1528_v50 = vpack.c.bf16 %v1431_v47, %v1431_v47  ;;  %v1346_v8 = vmul.f32 0.125, %v1340_v6 }
 0x29b   : > { %v1688_v51 = vsel %vm1667_vm15, %v1531_v48, 0  ;;  %v4303_v48 = vld [vmem:[%s4755_s24 + $0x70] sm:$0xff] }
 0x29c   : > { %v1577_v52 = vsel %vm1534_vm14, %v1528_v50, 0  ;;  %1697 = vmatpush.bf16.msrb.mxu1 %v1688_v51  ;;  %v1524_v10 = vpack.c.bf16 %v1346_v8, %v1346_v8  ;;  %1822 = vmatpush.bf16.msra.mxu0 %v4303_v48  ;;  %v4301_v50 = vld [vmem:[%s4755_s24 + $0x60] sm:$0xff]  ;;  %v4300_v51 = vld [vmem:[%s4755_s24 + $0x58] sm:$0xff] }
 0x29d   : > { %1586 = vmatpush.bf16.xpose.msra.mxu3 %v1577_v52  ;;  %v4312_v52 = vld [vmem:[%s4760_s29 + $0x78] sm:$0xff] }
 0x29e   : > { %v1517_v55 = vpop.f32.mrf.mxu2 }
 0x29f   : > { %v1518_v56 = vadd.f32 %v4442_v31, %v1517_v55  ;;  %v1432_v57 = vpop.f32.mrf.mxu1  ;;  %v1341_v60 = vpop.f32.mrf.mxu0  ;;  %v4311_v55 = vld [vmem:[%s4760_s29 + $0x70] sm:$0xff] }
 0x2a0   : > { %v1433_v58 = vadd.f32 %v4441_v26, %v1432_v57  ;;  %v1342_v12 = vadd.f32 %v4440_v27, %v1341_v60  ;;  %1823 = vmatpush.bf16.msra.mxu0 %v4302_v49  ;;  %1914 = vmatpush.bf16.msra.mxu1 %v4312_v52  ;;  %v4310_v57 = vld [vmem:[%s4760_s29 + $0x68] sm:$0xff] }
 0x2a1   : > { %v1532_v61 = vpack.c.bf16 %v1518_v56, %v1518_v56  ;;  %v4298_v56 = vld [vmem:[%s4755_s24 + $0x48] sm:$0xff] }
 0x2a2   : > { %v1529_v63 = vpack.c.bf16 %v1433_v58, %v1433_v58  ;;  %v1347_v13 = vmul.f32 0.125, %v1342_v12  ;;  %v4297_v58 = vld [vmem:[%s4755_s24 + $0x40] sm:$0xff]  ;;  %s5522_s24 = scalar_lea.vmem %s5450_s12, %s4731_s4  ;;  %s5527_s4 = sld [smem:[#allocation3_spill]] }
 0x2a3   : > { %v1707_v0 = vsel %vm1667_vm15, %v1532_v61, 0  ;;  %v4309_v61 = vld [vmem:[%s4760_s29 + $0x60] sm:$0xff] }
 0x2a4   : > { %v1596_v1 = vsel %vm1534_vm14, %v1529_v63, 0  ;;  %1716 = vmatpush.bf16.msrb.mxu2 %v1707_v0  ;;  %3781 = vmatmul.msk.bf16.vlgmr.msrb.gmra.mxu3 %vm1534_vm14, %v1523_v62  ;;  %v1525_v14 = vpack.c.bf16 %v1347_v13, %v1347_v13  ;;  %v4308_v62 = vld [vmem:[%s4760_s29 + $0x58] sm:$0xff]  ;;  %v4307_v63 = vld [vmem:[%s4760_s29 + $0x50] sm:$0xff] }
 0x2a5   : > { %1605 = vmatpush.bf16.xpose.msrb.mxu3 %v1596_v1  ;;  %1824 = vmatpush.bf16.msra.mxu0 %v4301_v50  ;;  %v4306_v1 = vld [vmem:[%s4760_s29 + $0x48] sm:$0xff] }
 0x2a6   : > { %v1519_v4 = vpop.f32.mrf.mxu2  ;;  %1915 = vmatpush.bf16.msra.mxu1 %v4311_v55 }
 0x2a7   : > { %v1520_v7 = vadd.f32 %v4442_v31, %v1519_v4 }
 0x2a8   : > { %p4243_p8 = scmp.ne.s32.totalorder %s5527_s4, 1 }
 0x2a9   : > { %v1533_v9 = vpack.c.bf16 %v1520_v7, %v1520_v7  ;;  %1825 = vmatpush.bf16.msra.mxu0 %v4300_v51  ;;  %s5528_s5 = sld [smem:[#allocation28_spill]] (!%p4243_p8) }
 0x2aa   : > { %1916 = vmatpush.bf16.msra.mxu1 %v4310_v57  ;;  %s5529_s30 = sld [smem:[#allocation29_spill]] (!%p4243_p8) }
 0x2ab   : > { %v1726_v11 = vsel %vm1667_vm15, %v1533_v9, 0 }
 0x2ad   : > { %1826 = vmatpush.bf16.msra.mxu0 %v4299_v53 }
 0x2ae   : > { %1917 = vmatpush.bf16.msra.mxu1 %v4309_v61 }
 0x2b1   : > { %1827 = vmatpush.bf16.msra.mxu0 %v4298_v56 }
 0x2b2   : > { %1918 = vmatpush.bf16.msra.mxu1 %v4308_v62 }
 0x2b4   : > { %3782 = vmatmul.msk.bf16.vlgmr.msra.gmra.mxu3 %vm1534_vm14, %v1524_v10 }
 0x2b5   : > { %1735 = vmatpush.bf16.msra.mxu3 %v1726_v11  ;;  %1828 = vmatpush.bf16.msra.mxu0 %v4297_v58 }
 0x2b6   : > { %1919 = vmatpush.bf16.msra.mxu1 %v4307_v63 }
 0x2ba   : > { %1920 = vmatpush.bf16.msra.mxu1 %v4306_v1 }
 0x2be   : > { %1921 = vmatpush.bf16.msra.mxu1 %v4305_v3 }
 0x2c4   : > { %3783 = vmatmul.msk.bf16.vlgmr.msrb.gmra.mxu3 %vm1534_vm14, %v1525_v14 }
 0x317   : > { %v1550_v18 = vpop.f32.mrf.mxu3 }
 0x318   : > { %v1611_v2 = vsel %vm1151_vm0, %v1550_v18, -1e+30  ;;  %v4320_v18 = vld [vmem:[%s5515_s19 + $0x78] sm:$0xff] }
 0x319   : > { %v1616_v19 = vsel %vm1615_vm1, %v1611_v2, -inf  ;;  %2003 = vmatpush.bf16.msra.mxu2 %v4320_v18 }
 0x31a   : > { %1617 = vmax.xlane.f32.xlu0 %v1616_v19 }
 0x31f   : > { %v1552_v20 = vpop.f32.mrf.mxu3 }
 0x327   : > { %v1569_v21 = vpop.f32.mrf.mxu3 }
 0x328   : > { %v1612_v22 = vsel %vm1151_vm0, %v1569_v21, -1e+30 }
 0x329   : > { %v1619_v23 = vsel %vm1615_vm1, %v1612_v22, -inf }
 0x32a   : > { %1620 = vmax.xlane.f32.xlu2 %v1619_v23  ;;  %v4318_v23 = vld [vmem:[%s5515_s19 + $0x68] sm:$0xff] }
 0x32f   : > { %v1571_v24 = vpop.f32.mrf.mxu3 }
 0x330   : > { %v4317_v24 = vld [vmem:[%s5515_s19 + $0x60] sm:$0xff] }
 0x337   : > { %v1588_v26 = vpop.f32.mrf.mxu3 }
 0x338   : > { %v1613_v36 = vsel %vm1151_vm0, %v1588_v26, -1e+30  ;;  %v4316_v26 = vld [vmem:[%s5515_s19 + $0x58] sm:$0xff] }
 0x339   : > { %v1622_v39 = vsel %vm1615_vm1, %v1613_v36, -inf }
 0x33f   : > { %v1590_v27 = vpop.f32.mrf.mxu3 }
 0x340   : > { %v4315_v27 = vld [vmem:[%s5515_s19 + $0x50] sm:$0xff] }
 0x347   : > { %v1607_v28 = vpop.f32.mrf.mxu3 }
 0x348   : > { %v1614_v29 = vsel %vm1151_vm0, %v1607_v28, -1e+30  ;;  %v4314_v28 = vld [vmem:[%s5515_s19 + $0x48] sm:$0xff] }
 0x349   : > { %v1625_v5 = vsel %vm1615_vm1, %v1614_v29, -inf }
 0x34a   : > { %1626 = vmax.xlane.f32.xlu0 %v1625_v5 }
 0x34f   : > { %v1609_v59 = vpop.f32.mrf.mxu3 }
 0x38d   : > { %v1618_v30 = vpop.xlane.xlu0 %1617 }
 0x38e   : > { %v1628_v31 = vsub.f32 %v1611_v2, %v1618_v30 }
 0x390   : > { %v1632_v32 = vmul.f32 1.442695, %v1628_v31 }
 0x392   : > { %4460 = vpow2.f32 %v1632_v32 }
 0x398   : > { %v4461_v33 = vpop.eup %4460 }
 0x399   : > { %v1640_v34 = vsel %vm1615_vm1, %v4461_v33, 0.0 }
 0x39a   : > { %1641 = vadd.xlane.f32.xlu2 %v1640_v34 }
 0x39d   : > { %v1621_v35 = vpop.xlane.xlu2 %1620 }
 0x39e   : > { %v1629_v37 = vsub.f32 %v1612_v22, %v1621_v35  ;;  %v4319_v22 = vld [vmem:[%s5515_s19 + $0x70] sm:$0xff] }
 0x39f   : > { %2004 = vmatpush.bf16.msra.mxu2 %v4319_v22 }
 0x3a0   : > { %v1634_v38 = vmul.f32 1.442695, %v1629_v37 }
 0x3a2   : > { %4462 = vpow2.f32 %v1634_v38  ;;  %1623 = vmax.xlane.f32.xlu2 %v1622_v39  ;;  %v4444_v38 = vld [vmem:[%s4776_s1 + $0x1] ss:$0 sm:$0xff] }
 0x3a3   : > { %2005 = vmatpush.bf16.msra.mxu2 %v4318_v23  ;;  %v4443_v39 = vld [vmem:[%s5520_s0 + $0x1] ss:$0 sm:$0xff] }
 0x3a7   : > { %2006 = vmatpush.bf16.msra.mxu2 %v4317_v24 }
 0x3a8   : > { %v4463_v40 = vpop.eup %4462 }
 0x3a9   : > { %v1643_v41 = vsel %vm1615_vm1, %v4463_v40, 0.0 }
 0x3aa   : > { %1644 = vadd.xlane.f32.xlu1 %v1643_v41 }
 0x3ab   : > { %2007 = vmatpush.bf16.msra.mxu2 %v4316_v26 }
 0x3af   : > { %2008 = vmatpush.bf16.msra.mxu2 %v4315_v27 }
 0x3b3   : > { %2009 = vmatpush.bf16.msra.mxu2 %v4314_v28 }
 0x3bd   : > { %v1627_v43 = vpop.xlane.xlu0 %1626 }
 0x3be   : > { %v1631_v44 = vsub.f32 %v1614_v29, %v1627_v43  ;;  %v4313_v29 = vld [vmem:[%s5515_s19 + $0x40] sm:$0xff] }
 0x3bf   : > { %2010 = vmatpush.bf16.msra.mxu2 %v4313_v29 }
 0x3c0   : > { %v1638_v45 = vmul.f32 1.442695, %v1631_v44 }
 0x3c2   : > { %4464 = vpow2.f32 %v1638_v45 }
 0x3c8   : > { %v4465_v46 = vpop.eup %4464 }
 0x3c9   : > { %v1649_v47 = vsel %vm1615_vm1, %v4465_v46, 0.0 }
 0x3ca   : > { %1650 = vadd.xlane.f32.xlu1 %v1649_v47 }
 0x40d   : > { %v1642_v0 = vpop.xlane.xlu2 %1641 }
 0x40e   : > { %4466 = vrcp.f32 %v1642_v0 }
 0x414   : > { %v4467_v4 = vpop.eup %4466 }
 0x415   : > { %v1656_v6 = vmul.f32 %v4467_v4, %v4461_v33  ;;  %v1624_v7 = vpop.xlane.xlu2 %1623 }
 0x416   : > { %v1630_v8 = vsub.f32 %v1613_v36, %v1624_v7 }
 0x417   : > { %v1660_v9 = vpack.c.bf16 %v1656_v6, %v1656_v6 }
 0x418   : > { %v1636_v10 = vmul.f32 1.442695, %v1630_v8 }
 0x419   : > { %3784 = vmatmul.msk.bf16.vlgmr.msrb.gmra.mxu0 %vm1615_vm1, %v1660_v9 }
 0x41a   : > { %4468 = vpow2.f32 %v1636_v10 }
 0x41d   : > { %v1645_v11 = vpop.xlane.xlu1 %1644 }
 0x41e   : > { %4470 = vrcp.f32 %v1645_v11 }
 0x420   : > { %v4469_v60 = vpop.eup %4468 }
 0x421   : > { %v1646_v12 = vsel %vm1615_vm1, %v4469_v60, 0.0 }
 0x422   : > { %1647 = vadd.xlane.f32.xlu0 %v1646_v12 }
 0x424   : > { %v4471_v13 = vpop.eup %4470 }
 0x425   : > { %v1657_v14 = vmul.f32 %v4471_v13, %v4463_v40  ;;  %v4445_v13 = vld [vmem:[%s5521_s27 + $0x1] ss:$0 sm:$0xff] }
 0x427   : > { %v1661_v15 = vpack.c.bf16 %v1657_v14, %v1657_v14 }
 0x429   : > { %3785 = vmatmul.msk.bf16.vlgmr.msrb.gmra.mxu1 %vm1615_vm1, %v1661_v15  ;;  %1829 = vmatmul.bf16.vlgmr.msra.gmra.mxu0 %v4940_v17 }
 0x439   : > { %1834 = vmatmul.bf16.gmra.mxu0 %v4947_v25  ;;  %1922 = vmatmul.bf16.vlgmr.msra.gmra.mxu1 %v4940_v17 }
 0x43d   : > { %v1651_v2 = vpop.xlane.xlu1 %1650 }
 0x43e   : > { %4472 = vrcp.f32 %v1651_v2 }
 0x444   : > { %v4473_v19 = vpop.eup %4472 }
 0x445   : > { %v1659_v20 = vmul.f32 %v4473_v19, %v4465_v46 }
 0x447   : > { %v1663_v21 = vpack.c.bf16 %v1659_v20, %v1659_v20 }
 0x449   : > { %3787 = vmatmul.msk.bf16.vlgmr.msra.gmra.mxu3 %vm1615_vm1, %v1663_v21  ;;  %1927 = vmatmul.bf16.gmra.mxu1 %v4947_v25 }
 0x495   : > { %v1648_v5 = vpop.xlane.xlu0 %1647 }
 0x496   : > { %4474 = vrcp.f32 %v1648_v5  ;;  %v5017_v59 = vpop.f32.mrf.mxu0 }
 0x49c   : > { %v4475_v30 = vpop.eup %4474 }
 0x49d   : > { %v1658_v31 = vmul.f32 %v4475_v30, %v4469_v60 }
 0x49e   : > { %v1682_v32 = vpop.f32.mrf.mxu0 }
 0x49f   : > { %v1662_v33 = vpack.c.bf16 %v1658_v31, %v1658_v31 }
 0x4a1   : > { %3786 = vmatmul.msk.bf16.vlgmr.msrb.gmra.mxu2 %vm1615_vm1, %v1662_v33 }
 0x4a6   : > { %v5020_v34 = vpop.f32.mrf.mxu1  ;;  %v1830_v37 = vpop.f32.mrf.mxu0 }
 0x4a7   : > { %v1741_v35 = vpack.c.bf16 %v5020_v34, %v5017_v59  ;;  %v1831_v42 = vadd.f32 %v4443_v39, %v1830_v37 }
 0x4a9   : > { %v1840_v46 = vmul.f32 0.125, %v1831_v42 }
 0x4ab   : > { %v2022_v49 = vpack.c.bf16 %v1840_v46, %v1840_v46 }
 0x4ae   : > { %v1701_v36 = vpop.f32.mrf.mxu1  ;;  %v1832_v44 = vpop.f32.mrf.mxu0 }
 0x4af   : > { %v1833_v55 = vadd.f32 %v4443_v39, %v1832_v44 }
 0x4b1   : > { %2011 = vmatmul.bf16.vlgmr.msra.gmra.mxu2 %v4940_v17  ;;  %v1841_v61 = vmul.f32 0.125, %v1833_v55 }
 0x4b6   : > { %v1923_v40 = vpop.f32.mrf.mxu1  ;;  %v1835_v17 = vpop.f32.mrf.mxu0 }
 0x4b7   : > { %v1924_v41 = vadd.f32 %v4444_v38, %v1923_v40  ;;  %v1836_v8 = vadd.f32 %v4443_v39, %v1835_v17 }
 0x4b9   : > { %v2026_v43 = vpack.c.bf16 %v1924_v41, %v1924_v41  ;;  %v1842_v10 = vmul.f32 0.125, %v1836_v8  ;;  %v4296_v8 = vld [vmem:[%s4787_s7 + $0x18] sm:$0xff] }
 0x4bb   : > { %v2038_v45 = vsel %vm1534_vm14, %v2026_v43, 0  ;;  %v2024_v11 = vpack.c.bf16 %v1842_v10, %v1842_v10  ;;  %v4295_v10 = vld [vmem:[%s4787_s7 + $0x10] sm:$0xff] }
 0x4bc   : > { %2047 = vmatpush.bf16.xpose.msrb.mxu3 %v2038_v45 }
 0x4be   : > { %v1925_v47 = vpop.f32.mrf.mxu1  ;;  %v1837_v62 = vpop.f32.mrf.mxu0 }
 0x4bf   : > { %v1926_v48 = vadd.f32 %v4444_v38, %v1925_v47  ;;  %v1838_v1 = vadd.f32 %v4443_v39, %v1837_v62 }
 0x4c1   : > { %v2027_v50 = vpack.c.bf16 %v1926_v48, %v1926_v48  ;;  %2016 = vmatmul.bf16.gmra.mxu2 %v4947_v25  ;;  %v2023_v25 = vpack.c.bf16 %v1841_v61, %v1841_v61  ;;  %v1843_v7 = vmul.f32 0.125, %v1838_v1 }
 0x4c3   : > { %v2057_v51 = vsel %vm1534_vm14, %v2027_v50, 0  ;;  %3935 = vmatmul.msk.bf16.vlgmr.msrb.gmra.mxu3 %vm1534_vm14, %v2022_v49  ;;  %v2025_v9 = vpack.c.bf16 %v1843_v7, %v1843_v7 }
 0x4c4   : > { %2066 = vmatpush.bf16.xpose.msra.mxu3 %v2057_v51 }
 0x4c6   : > { %v1928_v52 = vpop.f32.mrf.mxu1 }
 0x4c7   : > { %v1929_v53 = vadd.f32 %v4444_v38, %v1928_v52 }
 0x4c9   : > { %v2028_v56 = vpack.c.bf16 %v1929_v53, %v1929_v53 }
 0x4cb   : > { %v2076_v57 = vsel %vm1534_vm14, %v2028_v56, 0 }
 0x4cc   : > { %v5032_v58 = vpop.f32.mrf.mxu3  ;;  %2085 = vmatpush.bf16.xpose.msrb.mxu3 %v2076_v57 }
 0x4ce   : > { %v1930_v63 = vpop.f32.mrf.mxu1 }
 0x4cf   : > { %v1931_v0 = vadd.f32 %v4444_v38, %v1930_v63 }
 0x4d1   : > { %v2029_v3 = vpack.c.bf16 %v1931_v0, %v1931_v0 }
 0x4d3   : > { %v2095_v4 = vsel %vm1534_vm14, %v2029_v3, 0  ;;  %3936 = vmatmul.msk.bf16.vlgmr.msra.gmra.mxu3 %vm1534_vm14, %v2023_v25 }
 0x4d4   : > { %v1739_v6 = vpop.f32.mrf.mxu3  ;;  %2104 = vmatpush.bf16.xpose.msrb.mxu0 %v2095_v4 }
 0x4db   : > { %3938 = vmatmul.msk.bf16.vlgmr.msrb.gmra.mxu0 %vm1534_vm14, %v2025_v9 }
 0x4e3   : > { %3937 = vmatmul.msk.bf16.vlgmr.msrb.gmra.mxu3 %vm1534_vm14, %v2024_v11  ;;  %v4294_v11 = vld [vmem:[%s4787_s7 + $0x8] sm:$0xff] }
 0x524   : > { %v5038_v60 = vpop.f32.mrf.mxu2 }
 0x52c   : > { %v1720_v12 = vpop.f32.mrf.mxu2 }
 0x534   : > { %v2012_v14 = vpop.f32.mrf.mxu2 }
 0x535   : > { %v2013_v15 = vadd.f32 %v4445_v13, %v2012_v14  ;;  %v4293_v14 = vld [vmem:[%s4787_s7] sm:$0xff] }
 0x537   : > { %v2030_v18 = vpack.c.bf16 %v2013_v15, %v2013_v15 }
 0x539   : > { %v2166_v2 = vsel %vm1667_vm15, %v2030_v18, 0 }
 0x53a   : > { %2175 = vmatpush.bf16.msrb.mxu1 %v2166_v2 }
 0x53c   : > { %v2014_v19 = vpop.f32.mrf.mxu2 }
 0x53d   : > { %v2015_v20 = vadd.f32 %v4445_v13, %v2014_v19 }
 0x53f   : > { %v2031_v21 = vpack.c.bf16 %v2015_v20, %v2015_v20 }
 0x541   : > { %v2185_v22 = vsel %vm1667_vm15, %v2031_v21, 0 }
 0x542   : > { %2194 = vmatpush.bf16.msrb.mxu2 %v2185_v22 }
 0x544   : > { %v2017_v23 = vpop.f32.mrf.mxu2 }
 0x545   : > { %v2018_v24 = vadd.f32 %v4445_v13, %v2017_v23 }
 0x546   : > { %v2049_v26 = vpop.f32.mrf.mxu3  ;;  %2332 = vmatpush.bf16.msra.mxu2 %v4296_v8 }
 0x547   : > { %v2032_v27 = vpack.c.bf16 %v2018_v24, %v2018_v24  ;;  %v2110_v28 = vsel %vm1151_vm0, %v2049_v26, -1e+30 }
 0x548   : > { %v2114_v29 = vsel %vm1615_vm1, %v2110_v28, -inf }
 0x549   : > { %v2204_v5 = vsel %vm1667_vm15, %v2032_v27, 0  ;;  %2115 = vmax.xlane.f32.xlu2 %v2114_v29 }
 0x54a   : > { %2213 = vmatpush.bf16.msra.mxu3 %v2204_v5  ;;  %2333 = vmatpush.bf16.msra.mxu2 %v4295_v10  ;;  %v1742_v5 = vpack.c.bf16 %v5032_v58, %v5038_v60 }
 0x54c   : > { %v2019_v30 = vpop.f32.mrf.mxu2 }
 0x54d   : > { %v2020_v31 = vadd.f32 %v4445_v13, %v2019_v30  ;;  %v4324_v30 = vld [vmem:[%s4787_s7 + $0x38] sm:$0xff] }
 0x54e   : > { %v2051_v32 = vpop.f32.mrf.mxu3  ;;  %2334 = vmatpush.bf16.msra.mxu2 %v4294_v11  ;;  %2283 = vmatpush.bf16.msra.mxu1 %v4324_v30 }
 0x54f   : > { %v2033_v33 = vpack.c.bf16 %v2020_v31, %v2020_v31  ;;  %v4323_v31 = vld [vmem:[%s4787_s7 + $0x30] sm:$0xff]  ;;  %v4322_v32 = vld [vmem:[%s4787_s7 + $0x28] sm:$0xff] }
 0x551   : > { %v2223_v36 = vsel %vm1667_vm15, %v2033_v33, 0  ;;  %v4321_v33 = vld [vmem:[%s4787_s7 + $0x20] sm:$0xff] }
 0x552   : > { %2232 = vmatpush.bf16.msra.mxu0 %v2223_v36  ;;  %2335 = vmatpush.bf16.msra.mxu2 %v4293_v14 }
 0x553   : > { %2284 = vmatpush.bf16.msra.mxu1 %v4323_v31  ;;  %v4354_v31 = vld [vmem:[%s4806_s26 + $0xec] sm:$0xf] }
 0x556   : > { %v2068_v37 = vpop.f32.mrf.mxu3 }
 0x557   : > { %v2111_v38 = vsel %vm1151_vm0, %v2068_v37, -1e+30  ;;  %2285 = vmatpush.bf16.msra.mxu1 %v4322_v32  ;;  %v4111_v32 = vld [vmem:[%s4806_s26 + $0xf8] sm:$0xf0] }
 0x558   : > { %v2106_v39 = vpop.f32.mrf.mxu0  ;;  %v2117_v40 = vsel %vm1615_vm1, %v2111_v38, -inf }
 0x559   : > { %2118 = vmax.xlane.f32.xlu1 %v2117_v40  ;;  %v2113_v41 = vsel %vm1151_vm0, %v2106_v39, -1e+30 }
 0x55a   : > { %v2123_v44 = vsel %vm1615_vm1, %v2113_v41, -inf }
 0x55b   : > { %2286 = vmatpush.bf16.msra.mxu1 %v4321_v33  ;;  %v4114_v33 = vor.u32 %v4354_v31, %v4111_v32  ;;  %v4023_v31 = vld [vmem:[%s4806_s26 + $0x50] sm:$0xf0]  ;;  %v4029_v32 = vld [vmem:[%s4806_s26 + $0x48] sm:$0xf] }
 0x55e   : > { %v2070_v42 = vpop.f32.mrf.mxu3 }
 0x560   : > { %v2108_v43 = vpop.f32.mrf.mxu0 }
 0x561   : > { %2124 = vmax.xlane.f32.xlu1 %v2123_v44  ;;  %v4446_v44 = vld [vmem:[%s5522_s24] ss:$0 sm:$0xff] }
 0x566   : > { %v2087_v45 = vpop.f32.mrf.mxu3 }
 0x567   : > { %v2112_v46 = vsel %vm1151_vm0, %v2087_v45, -1e+30  ;;  %v4532_v45 = vld [vmem:[#allocation2 + $0x10] sm:$0xff] }
 0x568   : > { %v2120_v47 = vsel %vm1615_vm1, %v2112_v46, -inf }
 0x569   : > { %2121 = vmax.xlane.f32.xlu0 %v2120_v47 }
 0x56e   : > { %v2089_v48 = vpop.f32.mrf.mxu3 }
 0x5bc   : > { %v2116_v49 = vpop.xlane.xlu2 %2115 }
 0x5bd   : > { %v2126_v50 = vsub.f32 %v2110_v28, %v2116_v49 }
 0x5bf   : > { %v2130_v51 = vmul.f32 1.442695, %v2126_v50 }
 0x5c1   : > { %4476 = vpow2.f32 %v2130_v51  ;;  %v4533_v51 = vld [vmem:[#allocation2] sm:$0xff] }
 0x5c7   : > { %v4477_v17 = vpop.eup %4476 }
 0x5c8   : > { %v2138_v52 = vsel %vm1615_vm1, %v4477_v17, 0.0 }
 0x5c9   : > { %2139 = vadd.xlane.f32.xlu0 %v2138_v52 }
 0x5cc   : > { %v2119_v53 = vpop.xlane.xlu1 %2118 }
 0x5cd   : > { %v2127_v55 = vsub.f32 %v2111_v38, %v2119_v53 }
 0x5cf   : > { %v2132_v56 = vmul.f32 1.442695, %v2127_v55 }
 0x5d1   : > { %4478 = vpow2.f32 %v2132_v56 }
 0x5d4   : > { %v2125_v57 = vpop.xlane.xlu1 %2124 }
 0x5d5   : > { %v2129_v61 = vsub.f32 %v2113_v41, %v2125_v57  ;;  %v4534_v57 = vld [vmem:[#allocation2 + $0x18] sm:$0xff] }
 0x5d7   : > { %v4479_v16 = vpop.eup %4478  ;;  %v2136_v62 = vmul.f32 1.442695, %v2129_v61 }
 0x5d8   : > { %v2141_v63 = vsel %vm1615_vm1, %v4479_v16, 0.0 }
 0x5d9   : > { %4480 = vpow2.f32 %v2136_v62  ;;  %2142 = vadd.xlane.f32.xlu2 %v2141_v63 }
 0x5dc   : > { %v2122_v0 = vpop.xlane.xlu0 %2121 }
 0x5dd   : > { %v2128_v25 = vsub.f32 %v2112_v46, %v2122_v0 }
 0x5df   : > { %v4481_v1 = vpop.eup %4480  ;;  %v2134_v3 = vmul.f32 1.442695, %v2128_v25  ;;  %v4535_v25 = vld [vmem:[#allocation2 + $0x8] sm:$0xff] }
 0x5e0   : > { %v2147_v4 = vsel %vm1615_vm1, %v4481_v1, 0.0 }
 0x5e1   : > { %4482 = vpow2.f32 %v2134_v3  ;;  %2148 = vadd.xlane.f32.xlu2 %v2147_v4 }
 0x5e7   : > { %v4483_v6 = vpop.eup %4482 }
 0x5e8   : > { %v2144_v7 = vsel %vm1615_vm1, %v4483_v6, 0.0 }
 0x5e9   : > { %2145 = vadd.xlane.f32.xlu1 %v2144_v7 }
 0x63c   : > { %v2140_v9 = vpop.xlane.xlu0 %2139 }
 0x63d   : > { %4484 = vrcp.f32 %v2140_v9 }
 0x643   : > { %v4485_v12 = vpop.eup %4484 }
 0x644   : > { %v2154_v13 = vmul.f32 %v4485_v12, %v4477_v17 }
 0x646   : > { %v2158_v15 = vpack.c.bf16 %v2154_v13, %v2154_v13 }
 0x648   : > { %3939 = vmatmul.msk.bf16.vlgmr.msrb.gmra.mxu1 %vm1615_vm1, %v2158_v15 }
 0x64c   : > { %v2143_v18 = vpop.xlane.xlu2 %2142 }
 0x64d   : > { %4486 = vrcp.f32 %v2143_v18 }
 0x653   : > { %v4487_v2 = vpop.eup %4486 }
 0x654   : > { %v2155_v19 = vmul.f32 %v4487_v2, %v4479_v16  ;;  %v2149_v20 = vpop.xlane.xlu2 %2148 }
 0x655   : > { %4488 = vrcp.f32 %v2149_v20 }
 0x656   : > { %v2159_v21 = vpack.c.bf16 %v2155_v19, %v2155_v19 }
 0x658   : > { %3940 = vmatmul.msk.bf16.vlgmr.msrb.gmra.mxu2 %vm1615_vm1, %v2159_v21 }
 0x659   : > { %2716 = vmatpush.bf16.msrb.mxu2 %v4114_v33  ;;  %v4336_v33 = vld [vmem:[%s4806_s26 + $0x54] sm:$0xf0] }
 0x65b   : > { %v4489_v22 = vpop.eup %4488 }
 0x65c   : > { %v2157_v23 = vmul.f32 %v4489_v22, %v4481_v1  ;;  %v2146_v24 = vpop.xlane.xlu1 %2145  ;;  %v4101_v22 = vld [vmem:[%s4806_s26 + $0xe0] sm:$0xf] }
 0x65d   : > { %4490 = vrcp.f32 %v2146_v24  ;;  %v4353_v24 = vld [vmem:[%s4806_s26 + $0xe4] sm:$0xf] }
 0x65e   : > { %v2161_v26 = vpack.c.bf16 %v2157_v23, %v2157_v23  ;;  %v4355_v23 = vld [vmem:[%s4806_s26 + $0xec] sm:$0xf0] }
 0x660   : > { %3942 = vmatmul.msk.bf16.vlgmr.msra.gmra.mxu0 %vm1615_vm1, %v2161_v26  ;;  %v4102_v26 = vor.u32 %v4355_v23, %v4101_v22 }
 0x662   : > { %2659 = vmatpush.bf16.msrb.mxu3 %v4102_v26  ;;  %v4047_v26 = vld [vmem:[%s4806_s26 + $0x78] sm:$0xf0] }
 0x663   : > { %v4491_v27 = vpop.eup %4490 }
 0x664   : > { %v2156_v28 = vmul.f32 %v4491_v27, %v4483_v6  ;;  %v4103_v27 = vld [vmem:[%s4806_s26 + $0xf0] sm:$0xf0] }
 0x666   : > { %v2160_v29 = vpack.c.bf16 %v2156_v28, %v2156_v28  ;;  %v4109_v28 = vld [vmem:[%s4806_s26 + $0xe8] sm:$0xf] }
 0x668   : > { %3941 = vmatmul.msk.bf16.vlgmr.msra.gmra.mxu3 %vm1615_vm1, %v2160_v29  ;;  %3985 = vmatmul.msk.bf16.vlgmr.msra.gmra.mxu2 %vm1534_vm14, %v1741_v35  ;;  %v4356_v29 = vld [vmem:[%s4806_s26 + $0xf4] sm:$0xf0] }
 0x669   : > { %v4110_v30 = vor.u32 %v4356_v29, %v4109_v28  ;;  %v4021_v28 = vld [vmem:[%s4806_s26 + $0x40] sm:$0xf]  ;;  %v4335_v29 = vld [vmem:[%s4806_s26 + $0x4c] sm:$0xf0] }
 0x66b   : > { %2697 = vmatpush.bf16.msrb.mxu1 %v4110_v30  ;;  %v4022_v30 = vor.u32 %v4335_v29, %v4021_v28 }
 0x678   : > { %3986 = vmatmul.msk.bf16.gmra.mxu2 %vm1534_vm14, %v1742_v5  ;;  %v4106_v5 = vor.u32 %v4353_v24, %v4103_v27  ;;  %v4338_v24 = vld [vmem:[%s4806_s26 + $0x6c] sm:$0xf] }
 0x679   : > { %v4050_v27 = vor.u32 %v4338_v24, %v4047_v26 }
 0x67a   : > { %2678 = vmatpush.bf16.msrb.mxu0 %v4106_v5  ;;  %v4333_v5 = vld [vmem:[%s4806_s26 + $0x44] sm:$0xf] }
 0x6c5   : > { %v2177_v36 = vpop.f32.mrf.mxu1 }
 0x6cd   : > { %v2179_v37 = vpop.f32.mrf.mxu1 }
 0x6ce   : > { %v4351_v37 = vld [vmem:[%s4806_s26 + $0xcc] sm:$0xf0] }
 0x6db   : > { %v2196_v38 = vpop.f32.mrf.mxu2 }
 0x6dc   : > { %v2238_v59 = vpack.c.bf16 %v2196_v38, %v2177_v36  ;;  %v4085_v36 = vld [vmem:[%s4806_s26 + $0xc0] sm:$0xf]  ;;  %v4349_v38 = vld [vmem:[%s4806_s26 + $0xc4] sm:$0xf] }
 0x6dd   : > { %v2234_v34 = vpop.f32.mrf.mxu0 }
 0x6de   : > { %3967 = vmatmul.msk.bf16.vlgmr.msra.gmra.mxu1 %vm1534_vm14, %v2238_v59  ;;  %v4086_v59 = vor.u32 %v4351_v37, %v4085_v36  ;;  %v4026_v36 = vor.u32 %v4333_v5, %v4023_v31  ;;  %v4030_v37 = vor.u32 %v4336_v33, %v4029_v32 }
 0x6e0   : > { %2660 = vmatpush.bf16.msrb.mxu3 %v4086_v59  ;;  %v4031_v59 = vld [vmem:[%s4806_s26 + $0x58] sm:$0xf0] }
 0x6e3   : > { %v2198_v35 = vpop.f32.mrf.mxu2 }
 0x6e4   : > { %v4093_v35 = vld [vmem:[%s4806_s26 + $0xc8] sm:$0xf] }
 0x6e5   : > { %v2236_v58 = vpop.f32.mrf.mxu0 }
 0x6e6   : > { %v4352_v58 = vld [vmem:[%s4806_s26 + $0xd4] sm:$0xf0] }
 0x6eb   : > { %v2215_v60 = vpop.f32.mrf.mxu3  ;;  %v2337_v41 = vpop.f32.mrf.mxu2 }
 0x6ec   : > { %v2239_v39 = vpack.c.bf16 %v2234_v34, %v2215_v60  ;;  %v4087_v34 = vld [vmem:[%s4806_s26 + $0xd0] sm:$0xf0] }
 0x6ed   : > { %v4090_v60 = vor.u32 %v4349_v38, %v4087_v34  ;;  %v4334_v38 = vld [vmem:[%s4806_s26 + $0x4c] sm:$0xf] }
 0x6ee   : > { %3968 = vmatmul.msk.bf16.gmra.mxu1 %vm1534_vm14, %v2239_v39  ;;  %v4094_v39 = vor.u32 %v4352_v58, %v4093_v35  ;;  %v4034_v34 = vor.u32 %v4334_v38, %v4031_v59  ;;  %v4005_v35 = vld [vmem:[%s4806_s26 + $0x20] sm:$0xf]  ;;  %v4331_v58 = vld [vmem:[%s4806_s26 + $0x2c] sm:$0xf0] }
 0x6ef   : > { %2679 = vmatpush.bf16.msrb.mxu0 %v4090_v60  ;;  %v4329_v60 = vld [vmem:[%s4806_s26 + $0x24] sm:$0xf] }
 0x6f0   : > { %2698 = vmatpush.bf16.msrb.mxu1 %v4094_v39  ;;  %v4006_v39 = vor.u32 %v4331_v58, %v4005_v35 }
 0x6f3   : > { %v2217_v40 = vpop.f32.mrf.mxu3  ;;  %v2339_v47 = vpop.f32.mrf.mxu2 }
 0x6f4   : > { %v4350_v40 = vld [vmem:[%s4806_s26 + $0xcc] sm:$0xf] }
 0x6fb   : > { %v2342_v53 = vpop.f32.mrf.mxu2 }
 0x703   : > { %v2344_v62 = vpop.f32.mrf.mxu2 }
 0x75b   : > { %v2288_v42 = vpop.f32.mrf.mxu1 }
 0x75c   : > { %v2338_v43 = vadd.f32 %v2337_v41, %v2288_v42  ;;  %v4095_v41 = vld [vmem:[%s4806_s26 + $0xd8] sm:$0xf0] }
 0x75d   : > { %v4098_v42 = vor.u32 %v4350_v40, %v4095_v41  ;;  %v4007_v40 = vld [vmem:[%s4806_s26 + $0x30] sm:$0xf0]  ;;  %v4013_v41 = vld [vmem:[%s4806_s26 + $0x28] sm:$0xf] }
 0x75e   : > { %v2347_v46 = vadd.f32 %v4532_v45, %v2338_v43  ;;  %v4069_v43 = vld [vmem:[%s4806_s26 + $0xa0] sm:$0xf]  ;;  %v4345_v45 = vld [vmem:[%s4806_s26 + $0xa4] sm:$0xf] }
 0x75f   : > { %2717 = vmatpush.bf16.msrb.mxu2 %v4098_v42  ;;  %v4332_v42 = vld [vmem:[%s4806_s26 + $0x34] sm:$0xf0] }
 0x760   : > { %v5087_v48 = vadd.f32 %v4446_v44, %v2347_v46 }
 0x762   : > { %2361 = vadd.xlane.f32.xlu0 %v5087_v48 }
 0x763   : > { %v2290_v49 = vpop.f32.mrf.mxu1 }
 0x764   : > { %v2340_v50 = vadd.f32 %v2339_v47, %v2290_v49  ;;  %v4071_v47 = vld [vmem:[%s4806_s26 + $0xb0] sm:$0xf0]  ;;  %v4077_v49 = vld [vmem:[%s4806_s26 + $0xa8] sm:$0xf] }
 0x766   : > { %v2348_v17 = vadd.f32 %v4533_v51, %v2340_v50  ;;  %v4348_v50 = vld [vmem:[%s4806_s26 + $0xb4] sm:$0xf0]  ;;  %v4074_v51 = vor.u32 %v4345_v45, %v4071_v47  ;;  %v4014_v45 = vor.u32 %v4332_v42, %v4013_v41  ;;  %v4015_v47 = vld [vmem:[%s4806_s26 + $0x38] sm:$0xf0] }
 0x768   : > { %v5090_v52 = vadd.f32 %v4446_v44, %v2348_v17  ;;  %v4078_v17 = vor.u32 %v4348_v50, %v4077_v49  ;;  %2680 = vmatpush.bf16.msrb.mxu0 %v4074_v51  ;;  %v3989_v51 = vld [vmem:[%s4806_s26] sm:$0xf] }
 0x76a   : > { %2363 = vadd.xlane.f32.xlu1 %v5090_v52  ;;  %2699 = vmatpush.bf16.msrb.mxu1 %v4078_v17  ;;  %v4327_v17 = vld [vmem:[%s4806_s26 + $0xc] sm:$0xf0] }
 0x76b   : > { %v2293_v55 = vpop.f32.mrf.mxu1 }
 0x76c   : > { %v2343_v56 = vadd.f32 %v2342_v53, %v2293_v55  ;;  %v4346_v53 = vld [vmem:[%s4806_s26 + $0xac] sm:$0xf]  ;;  %v4079_v55 = vld [vmem:[%s4806_s26 + $0xb8] sm:$0xf0] }
 0x76e   : > { %v2349_v61 = vadd.f32 %v4534_v57, %v2343_v56  ;;  %v4082_v56 = vor.u32 %v4346_v53, %v4079_v55  ;;  %v4053_v57 = vld [vmem:[%s4806_s26 + $0x80] sm:$0xf]  ;;  %v4325_v53 = vld [vmem:[%s4806_s26 + $0x4] sm:$0xf] }
 0x770   : > { %v5093_v16 = vadd.f32 %v4446_v44, %v2349_v61  ;;  %v4343_v61 = vld [vmem:[%s4806_s26 + $0x8c] sm:$0xf0]  ;;  %2718 = vmatpush.bf16.msrb.mxu2 %v4082_v56  ;;  %v3990_v56 = vor.u32 %v4327_v17, %v3989_v51 }
 0x772   : > { %2365 = vadd.xlane.f32.xlu2 %v5093_v16 }
 0x773   : > { %v2295_v63 = vpop.f32.mrf.mxu1 }
 0x774   : > { %v2345_v0 = vadd.f32 %v2344_v62, %v2295_v63  ;;  %v4341_v62 = vld [vmem:[%s4806_s26 + $0x84] sm:$0xf]  ;;  %v4054_v63 = vor.u32 %v4343_v61, %v4053_v57  ;;  %v3991_v57 = vld [vmem:[%s4806_s26 + $0x10] sm:$0xf0]  ;;  %v3997_v61 = vld [vmem:[%s4806_s26 + $0x8] sm:$0xf] }
 0x776   : > { %v2350_v1 = vadd.f32 %v4535_v25, %v2345_v0  ;;  %v4055_v0 = vld [vmem:[%s4806_s26 + $0x90] sm:$0xf0]  ;;  %v4061_v25 = vld [vmem:[%s4806_s26 + $0x88] sm:$0xf] }
 0x778   : > { %v5096_v3 = vadd.f32 %v4446_v44, %v2350_v1  ;;  %v4347_v44 = vld [vmem:[%s4806_s26 + $0xac] sm:$0xf0]  ;;  %v4344_v1 = vld [vmem:[%s4806_s26 + $0x94] sm:$0xf0] }
 0x779   : > { %v4070_v46 = vor.u32 %v4347_v44, %v4069_v43  ;;  %v4010_v44 = vor.u32 %v4329_v60, %v4007_v40 }
 0x77a   : > { %2367 = vadd.xlane.f32.xlu0 %v5096_v3 }
 0x77b   : > { %2661 = vmatpush.bf16.msrb.mxu3 %v4070_v46  ;;  %v4330_v46 = vld [vmem:[%s4806_s26 + $0x2c] sm:$0xf] }
 0x77c   : > { %v4018_v50 = vor.u32 %v4330_v46, %v4015_v47 }
 0x77f   : > { %2662 = vmatpush.bf16.msrb.mxu3 %v4054_v63  ;;  %v4328_v63 = vld [vmem:[%s4806_s26 + $0x14] sm:$0xf0] }
 0x7d5   : > { %v2362_v4 = vpop.xlane.xlu0 %2361 }
 0x7d6   : > { %v2369_v6 = vmul.f32 %v2362_v4, %v4878_v54  ;;  %v4058_v4 = vor.u32 %v4341_v62, %v4055_v0  ;;  %v3994_v62 = vor.u32 %v4325_v53, %v3991_v57  ;;  %v4326_v0 = vld [vmem:[%s4806_s26 + $0xc] sm:$0xf] }
 0x7d8   : > { %v5101_v7 = vsub.f32 %v5087_v48, %v2369_v6  ;;  %v4062_v6 = vor.u32 %v4344_v1, %v4061_v25  ;;  %2681 = vmatpush.bf16.msrb.mxu0 %v4058_v4  ;;  %v3999_v25 = vld [vmem:[%s4806_s26 + $0x18] sm:$0xf0]  ;;  %v3998_v1 = vor.u32 %v4328_v63, %v3997_v61 }
 0x7d9   : > { %v4002_v4 = vor.u32 %v4326_v0, %v3999_v25  ;;  %v4380_v0 = vld [vmem:[%s4816_s8 + $0xb8] sm:$0xff]  ;;  %v4379_v25 = vld [vmem:[%s4816_s8 + $0xb0] sm:$0xff] }
 0x7da   : > { %v2377_v8 = vmul.f32 %v5101_v7, %v5101_v7  ;;  %2700 = vmatpush.bf16.msrb.mxu1 %v4062_v6 }
 0x7dc   : > { %2381 = vadd.xlane.f32.xlu1 %v2377_v8  ;;  %v4342_v8 = vld [vmem:[%s4806_s26 + $0x8c] sm:$0xf] }
 0x7dd   : > { %v2364_v9 = vpop.xlane.xlu1 %2363 }
 0x7de   : > { %v2370_v10 = vmul.f32 %v2364_v9, %v4878_v54  ;;  %v4063_v9 = vld [vmem:[%s4806_s26 + $0x98] sm:$0xf0] }
 0x7e0   : > { %v5107_v11 = vsub.f32 %v5090_v52, %v2370_v10  ;;  %v4066_v10 = vor.u32 %v4342_v8, %v4063_v9 }
 0x7e2   : > { %v2378_v12 = vmul.f32 %v5107_v11, %v5107_v11  ;;  %2719 = vmatpush.bf16.msrb.mxu2 %v4066_v10 }
 0x7e4   : > { %2383 = vadd.xlane.f32.xlu2 %v2378_v12  ;;  %v4037_v12 = vld [vmem:[%s4806_s26 + $0x60] sm:$0xf] }
 0x7e5   : > { %v2366_v13 = vpop.xlane.xlu2 %2365 }
 0x7e6   : > { %v2371_v14 = vmul.f32 %v2366_v13, %v4878_v54  ;;  %v4339_v13 = vld [vmem:[%s4806_s26 + $0x6c] sm:$0xf0]  ;;  %2720 = vmatpush.bf16.msrb.mxu2 %v4050_v27 }
 0x7e8   : > { %v5113_v15 = vsub.f32 %v5093_v16, %v2371_v14  ;;  %v4337_v14 = vld [vmem:[%s4806_s26 + $0x64] sm:$0xf] }
 0x7ea   : > { %v2379_v18 = vmul.f32 %v5113_v15, %v5113_v15  ;;  %2721 = vmatpush.bf16.msrb.mxu2 %v4034_v34 }
 0x7ec   : > { %2385 = vadd.xlane.f32.xlu0 %v2379_v18  ;;  %v4038_v18 = vor.u32 %v4339_v13, %v4037_v12 }
 0x7ed   : > { %v2368_v2 = vpop.xlane.xlu0 %2367 }
 0x7ee   : > { %v2372_v19 = vmul.f32 %v2368_v2, %v4878_v54  ;;  %v4039_v2 = vld [vmem:[%s4806_s26 + $0x70] sm:$0xf0]  ;;  %2663 = vmatpush.bf16.msrb.mxu3 %v4038_v18  ;;  %2722 = vmatpush.bf16.msrb.mxu2 %v4018_v50 }
 0x7ef   : > { %v4042_v22 = vor.u32 %v4337_v14, %v4039_v2 }
 0x7f0   : > { %v5119_v20 = vsub.f32 %v5096_v3, %v2372_v19  ;;  %v4045_v19 = vld [vmem:[%s4806_s26 + $0x68] sm:$0xf] }
 0x7f1   : > { %2682 = vmatpush.bf16.msrb.mxu0 %v4042_v22 }
 0x7f2   : > { %v2380_v21 = vmul.f32 %v5119_v20, %v5119_v20  ;;  %2664 = vmatpush.bf16.msrb.mxu3 %v4022_v30  ;;  %2723 = vmatpush.bf16.msrb.mxu2 %v4002_v4  ;;  %v4388_v4 = vld [vmem:[%s4816_s8 + $0xf8] sm:$0xff] }
 0x7f4   : > { %2387 = vadd.xlane.f32.xlu1 %v2380_v21  ;;  %v4340_v21 = vld [vmem:[%s4806_s26 + $0x74] sm:$0xf0] }
 0x7f5   : > { %v4046_v23 = vor.u32 %v4340_v21, %v4045_v19  ;;  %2683 = vmatpush.bf16.msrb.mxu0 %v4026_v36  ;;  %v4447_v36 = vld [vmem:[%s5523_s2] ss:$0 sm:$0xff] }
 0x7f6   : > { %2665 = vmatpush.bf16.msrb.mxu3 %v4006_v39  ;;  %3204 = vmatpush.bf16.msra.mxu2 %v4388_v4 }
 0x7f7   : > { %2701 = vmatpush.bf16.msrb.mxu1 %v4046_v23 }
 0x7f9   : > { %2684 = vmatpush.bf16.msrb.mxu0 %v4010_v44 }
 0x7fa   : > { %2666 = vmatpush.bf16.msrb.mxu3 %v3990_v56 }
 0x7fb   : > { %2702 = vmatpush.bf16.msrb.mxu1 %v4030_v37 }
 0x7fd   : > { %2685 = vmatpush.bf16.msrb.mxu0 %v3994_v62 }
 0x7ff   : > { %2703 = vmatpush.bf16.msrb.mxu1 %v4014_v45 }
 0x803   : > { %2704 = vmatpush.bf16.msrb.mxu1 %v3998_v1  ;;  %v4364_v1 = vld [vmem:[%s4816_s8 + $0x38] sm:$0xff] }
 0x804   : > { %3147 = vmatpush.bf16.msra.mxu3 %v4364_v1 }
 0x807   : > { %3185 = vmatpush.bf16.msra.mxu1 %v4380_v0 }
 0x80b   : > { %3186 = vmatpush.bf16.msra.mxu1 %v4379_v25 }
 0x84f   : > { %v2382_v43 = vpop.xlane.xlu1 %2381 }
 0x850   : > { %v2389_v49 = vmul.f32 %v2382_v43, %v4878_v54 }
 0x852   : > { %v2393_v55 = vadd.f32 1e-06, %v2389_v49 }
 0x854   : > { %4492 = vrsqrt.f32 %v2393_v55  ;;  %vm2403_vm3 = vweird.f32 %v2393_v55 }
 0x857   : > { %v2384_v6 = vpop.xlane.xlu2 %2383 }
 0x858   : > { %v2390_v8 = vmul.f32 %v2384_v6, %v4878_v54  ;;  %v4370_v6 = vld [vmem:[%s4816_s8 + $0x68] sm:$0xff] }
 0x85a   : > { %v4493_v9 = vpop.eup %4492  ;;  %v2394_v10 = vadd.f32 1e-06, %v2390_v8  ;;  %v4378_v8 = vld [vmem:[%s4816_s8 + $0xa8] sm:$0xff] }
 0x85b   : > { %v2398_v12 = vmul.f32 %v4493_v9, %v2393_v55  ;;  %vm2404_vm2 = vweird.f32 %v4493_v9  ;;  %3187 = vmatpush.bf16.msra.mxu1 %v4378_v8 }
 0x85c   : > { %4494 = vrsqrt.f32 %v2394_v10  ;;  %vm2405_vm4 = vmor %vm2403_vm3, %vm2404_vm2  ;;  %vm2413_vm6 = vweird.f32 %v2394_v10 }
 0x85d   : > { %v2399_v13 = vmul.f32 %v4493_v9, %v2398_v12  ;;  %v4369_v12 = vld [vmem:[%s4816_s8 + $0x60] sm:$0xff] }
 0x85f   : > { %v2400_v14 = vmul.f32 0.5, %v2399_v13  ;;  %v2386_v18 = vpop.xlane.xlu0 %2385  ;;  %v4377_v13 = vld [vmem:[%s4816_s8 + $0xa0] sm:$0xff] }
 0x860   : > { %v2391_v2 = vmul.f32 %v2386_v18, %v4878_v54  ;;  %3188 = vmatpush.bf16.msra.mxu1 %v4377_v13  ;;  %v4386_v18 = vld [vmem:[%s4816_s8 + $0xe8] sm:$0xff] }
 0x861   : > { %v2401_v19 = vsub.f32 1.5, %v2400_v14  ;;  %v4362_v14 = vld [vmem:[%s4816_s8 + $0x28] sm:$0xff] }
 0x862   : > { %v4495_v21 = vpop.eup %4494  ;;  %v2395_v22 = vadd.f32 1e-06, %v2391_v2  ;;  %v4368_v2 = vld [vmem:[%s4816_s8 + $0x58] sm:$0xff] }
 0x863   : > { %v2402_v23 = vmul.f32 %v4493_v9, %v2401_v19  ;;  %v2408_v24 = vmul.f32 %v4495_v21, %v2394_v10  ;;  %vm2414_vm5 = vweird.f32 %v4495_v21  ;;  %v4387_v10 = vld [vmem:[%s4816_s8 + $0xf0] sm:$0xff]  ;;  %v4376_v19 = vld [vmem:[%s4816_s8 + $0x98] sm:$0xff] }
 0x864   : > { %4496 = vrsqrt.f32 %v2395_v22  ;;  %vm2415_vm7 = vmor %vm2413_vm6, %vm2414_vm5  ;;  %vm2423_vm9 = vweird.f32 %v2395_v22  ;;  %3205 = vmatpush.bf16.msra.mxu2 %v4387_v10  ;;  %3189 = vmatpush.bf16.msra.mxu1 %v4376_v19 }
 0x865   : > { %v2409_v26 = vmul.f32 %v4495_v21, %v2408_v24  ;;  %v2406_v27 = vsel %vm2405_vm4, %v4493_v9, %v2402_v23  ;;  %v4363_v9 = vld [vmem:[%s4816_s8 + $0x30] sm:$0xff]  ;;  %v2489_v23 = vld [vmem:[%s4811_s20] sm:$0xf] }
 0x866   : > { %v2437_v32 = vmul.f32 %v2406_v27, %v5101_v7  ;;  %v4448_v7 = vld [vmem:[%s5525_s14] ss:$0 sm:$0xff]  ;;  %3148 = vmatpush.bf16.msra.mxu3 %v4363_v9  ;;  %v4367_v24 = vld [vmem:[%s4816_s8 + $0x50] sm:$0xff]  ;;  %v5226_v27 = vperm.slane %v2489_v23, 1 }
 0x867   : > { %v2410_v28 = vmul.f32 0.5, %v2409_v26  ;;  %v2388_v29 = vpop.xlane.xlu1 %2387  ;;  %v4375_v26 = vld [vmem:[%s4816_s8 + $0x90] sm:$0xff] }
 0x868   : > { %v2392_v5 = vmul.f32 %v2388_v29, %v4878_v54  ;;  %v2444_v58 = vmul.f32 %v4447_v36, %v2437_v32  ;;  %3206 = vmatpush.bf16.msra.mxu2 %v4386_v18  ;;  %3190 = vmatpush.bf16.msra.mxu1 %v4375_v26  ;;  %v4360_v29 = vld [vmem:[%s4816_s8 + $0x18] sm:$0xff]  ;;  %v4374_v32 = vld [vmem:[%s4816_s8 + $0x88] sm:$0xff] }
 0x869   : > { %v2411_v30 = vsub.f32 1.5, %v2410_v28  ;;  %v5228_v28 = vperm.slane %v2489_v23, 2 }
 0x86a   : > { %v4497_v31 = vpop.eup %4496  ;;  %v2396_v33 = vadd.f32 1e-06, %v2392_v5  ;;  %v2451_v42 = vadd.f32 %v4448_v7, %v2444_v58  ;;  %3149 = vmatpush.bf16.msra.mxu3 %v4362_v14  ;;  %v4384_v5 = vld [vmem:[%s4816_s8 + $0xd8] sm:$0xff] }
 0x86b   : > { %v2412_v37 = vmul.f32 %v4495_v21, %v2411_v30  ;;  %v2418_v38 = vmul.f32 %v4497_v31, %v2395_v22  ;;  %vm2424_vm8 = vweird.f32 %v4497_v31  ;;  %v4385_v22 = vld [vmem:[%s4816_s8 + $0xe0] sm:$0xff] }
 0x86c   : > { %4498 = vrsqrt.f32 %v2396_v33  ;;  %vm2425_vm10 = vmor %vm2423_vm9, %vm2424_vm8  ;;  %vm2433_vm12 = vweird.f32 %v2396_v33  ;;  %3207 = vmatpush.bf16.msra.mxu2 %v4385_v22  ;;  %3191 = vmatpush.bf16.msra.mxu1 %v4374_v32 }
 0x86d   : > { %v2416_v59 = vsel %vm2415_vm7, %v4495_v21, %v2412_v37  ;;  %v2419_v34 = vmul.f32 %v4497_v31, %v2418_v38  ;;  %v4361_v21 = vld [vmem:[%s4816_s8 + $0x20] sm:$0xff]  ;;  %v4359_v38 = vld [vmem:[%s4816_s8 + $0x10] sm:$0xff] }
 0x86e   : > { %v2438_v35 = vmul.f32 %v2416_v59, %v5107_v11  ;;  %3150 = vmatpush.bf16.msra.mxu3 %v4361_v21  ;;  %v4383_v59 = vld [vmem:[%s4816_s8 + $0xd0] sm:$0xff] }
 0x86f   : > { %v2420_v60 = vmul.f32 0.5, %v2419_v34 }
 0x870   : > { %v2445_v39 = vmul.f32 %v4447_v36, %v2438_v35  ;;  %3208 = vmatpush.bf16.msra.mxu2 %v4384_v5  ;;  %v5244_v35 = vperm.slane %v2489_v23, 0 }
 0x871   : > { %v2421_v40 = vsub.f32 1.5, %v2420_v60  ;;  %v4365_v60 = vld [vmem:[%s4816_s8 + $0x40] sm:$0xff] }
 0x872   : > { %v4499_v41 = vpop.eup %4498  ;;  %v2452_v43 = vadd.f32 %v4448_v7, %v2445_v39  ;;  %3151 = vmatpush.bf16.msra.mxu3 %v4360_v29  ;;  %v4373_v39 = vld [vmem:[%s4816_s8 + $0x80] sm:$0xff] }
 0x873   : > { %v2422_v44 = vmul.f32 %v4497_v31, %v2421_v40  ;;  %v2428_v45 = vmul.f32 %v4499_v41, %v2396_v33  ;;  %vm2434_vm11 = vweird.f32 %v4499_v41  ;;  %3192 = vmatpush.bf16.msra.mxu1 %v4373_v39 }
 0x874   : > { %v2455_v46 = vpack.c.bf16 %v2452_v43, %v2451_v42  ;;  %vm2435_vm13 = vmor %vm2433_vm12, %vm2434_vm11  ;;  %3209 = vmatpush.bf16.msra.mxu2 %v4383_v59  ;;  %v4358_v43 = vld [vmem:[%s4816_s8 + $0x8] sm:$0xff] }
 0x875   : > { %v2429_v47 = vmul.f32 %v4499_v41, %v2428_v45  ;;  %v2426_v11 = vsel %vm2425_vm10, %v4497_v31, %v2422_v44  ;;  %v4366_v31 = vld [vmem:[%s4816_s8 + $0x48] sm:$0xff] }
 0x876   : > { %2667 = vmatmul.bf16.vlgmr.msrb.gmra.mxu3 %v2455_v46  ;;  %2686 = vmatmul.bf16.vlgmr.msrb.gmra.mxu0 %v2455_v46  ;;  %v2439_v51 = vmul.f32 %v2426_v11, %v5113_v15  ;;  %v4372_v15 = vld [vmem:[%s4816_s8 + $0x78] sm:$0xff]  ;;  %v4382_v44 = vld [vmem:[%s4816_s8 + $0xc8] sm:$0xff] }
 0x877   : > { %v2430_v49 = vmul.f32 0.5, %v2429_v47  ;;  %2705 = vmatmul.bf16.vlgmr.msrb.gmra.mxu1 %v2455_v46  ;;  %2724 = vmatmul.bf16.vlgmr.msrb.gmra.mxu2 %v2455_v46 }
 0x878   : > { %v2446_v56 = vmul.f32 %v4447_v36, %v2439_v51  ;;  %3166 = vmatpush.bf16.msra.mxu0 %v4372_v15  ;;  %3152 = vmatpush.bf16.msra.mxu3 %v4359_v38 }
 0x879   : > { %v2431_v50 = vsub.f32 1.5, %v2430_v49  ;;  %3210 = vmatpush.bf16.msra.mxu2 %v4382_v44 }
 0x87a   : > { %v2453_v61 = vadd.f32 %v4448_v7, %v2446_v56 }
 0x87b   : > { %v2432_v17 = vmul.f32 %v4499_v41, %v2431_v50 }
 0x87c   : > { %3153 = vmatpush.bf16.msra.mxu3 %v4358_v43 }
 0x87d   : > { %v2436_v53 = vsel %vm2435_vm13, %v4499_v41, %v2432_v17 }
 0x87e   : > { %v2440_v55 = vmul.f32 %v2436_v53, %v5119_v20  ;;  %v4371_v20 = vld [vmem:[%s4816_s8 + $0x70] sm:$0xff] }
 0x87f   : > { %3167 = vmatpush.bf16.msra.mxu0 %v4371_v20 }
 0x880   : > { %v2447_v57 = vmul.f32 %v4447_v36, %v2440_v55 }
 0x882   : > { %v2454_v62 = vadd.f32 %v4448_v7, %v2447_v57  ;;  %v5248_v7 = vperm.slane %v2489_v23, 3 }
 0x883   : > { %3168 = vmatpush.bf16.msra.mxu0 %v4370_v6 }
 0x884   : > { %v2456_v63 = vpack.c.bf16 %v2454_v62, %v2453_v61  ;;  %v4357_v62 = vld [vmem:[%s4816_s8] sm:$0xff] }
 0x885   : > { %3154 = vmatpush.bf16.msra.mxu3 %v4357_v62 }
 0x886   : > { %2672 = vmatmul.bf16.gmra.mxu3 %v2456_v63  ;;  %2691 = vmatmul.bf16.gmra.mxu0 %v2456_v63 }
 0x887   : > { %2710 = vmatmul.bf16.gmra.mxu1 %v2456_v63  ;;  %2729 = vmatmul.bf16.gmra.mxu2 %v2456_v63  ;;  %v4381_v63 = vld [vmem:[%s4816_s8 + $0xc0] sm:$0xff] }
 0x888   : > { %3169 = vmatpush.bf16.msra.mxu0 %v4369_v12  ;;  %3211 = vmatpush.bf16.msra.mxu2 %v4381_v63 }
 0x88c   : > { %3170 = vmatpush.bf16.msra.mxu0 %v4368_v2 }
 0x890   : > { %3171 = vmatpush.bf16.msra.mxu0 %v4367_v24 }
 0x894   : > { %3172 = vmatpush.bf16.msra.mxu0 %v4366_v31 }
 0x898   : > { %3173 = vmatpush.bf16.msra.mxu0 %v4365_v60 }
 0x8f3   : > { %v2687_v30 = vpop.f32.mrf.mxu0 }
 0x8f4   : > { %v5235_v33 = vadd.f32 %v2687_v30, %v5226_v27  ;;  %v2706_v36 = vpop.f32.mrf.mxu1 }
 0x8f5   : > { %v5238_v37 = vadd.f32 %v2706_v36, %v5228_v28 }
 0x8f6   : > { %v2736_v34 = vmul.f32 %v5235_v33, %v5235_v33 }
 0x8f7   : > { %v2737_v58 = vmul.f32 %v5238_v37, %v5238_v37 }
 0x8f8   : > { %v2752_v40 = vmul.f32 %v2736_v34, %v5235_v33 }
 0x8f9   : > { %v2753_v41 = vmul.f32 %v2737_v58, %v5238_v37  ;;  %v2668_v42 = vpop.f32.mrf.mxu3 }
 0x8fa   : > { %v2768_v45 = vmul.f32 0.044715, %v2752_v40  ;;  %v5257_v46 = vadd.f32 %v2668_v42, %v5244_v35  ;;  %v2725_v47 = vpop.f32.mrf.mxu2 }
 0x8fb   : > { %v2769_v11 = vmul.f32 0.044715, %v2753_v41  ;;  %v5260_v49 = vadd.f32 %v2725_v47, %v5248_v7  ;;  %v2689_v50 = vpop.f32.mrf.mxu0 }
 0x8fc   : > { %v2784_v51 = vadd.f32 %v2768_v45, %v5235_v33  ;;  %v2735_v17 = vmul.f32 %v5257_v46, %v5257_v46  ;;  %v5266_v53 = vadd.f32 %v2689_v50, %v5226_v27  ;;  %v2708_v55 = vpop.f32.mrf.mxu1 }
 0x8fd   : > { %v2785_v56 = vadd.f32 %v2769_v11, %v5238_v37  ;;  %v2738_v57 = vmul.f32 %v5260_v49, %v5260_v49  ;;  %v5272_v61 = vadd.f32 %v2708_v55, %v5228_v28 }
 0x8fe   : > { %v2800_v15 = vmul.f32 0.7978846, %v2784_v51  ;;  %v2751_v0 = vmul.f32 %v2735_v17, %v5257_v46  ;;  %v2740_v20 = vmul.f32 %v5266_v53, %v5266_v53 }
 0x8ff   : > { %v2801_v25 = vmul.f32 0.7978846, %v2785_v56  ;;  %v2754_v1 = vmul.f32 %v2738_v57, %v5260_v49  ;;  %v2741_v4 = vmul.f32 %v5272_v61, %v5272_v61 }
 0x900   : > { %4500 = vtanh.f32 %v2800_v15  ;;  %v2767_v6 = vmul.f32 0.044715, %v2751_v0  ;;  %v2756_v8 = vmul.f32 %v2740_v20, %v5266_v53 }
 0x901   : > { %4502 = vtanh.f32 %v2801_v25  ;;  %v2770_v9 = vmul.f32 0.044715, %v2754_v1  ;;  %v2757_v10 = vmul.f32 %v2741_v4, %v5272_v61  ;;  %v2670_v12 = vpop.f32.mrf.mxu3 }
 0x902   : > { %v2783_v13 = vadd.f32 %v2767_v6, %v5257_v46  ;;  %v2772_v14 = vmul.f32 0.044715, %v2756_v8  ;;  %v5286_v18 = vadd.f32 %v2670_v12, %v5244_v35  ;;  %v2727_v2 = vpop.f32.mrf.mxu2 }
 0x903   : > { %v2786_v19 = vadd.f32 %v2770_v9, %v5260_v49  ;;  %v2773_v21 = vmul.f32 0.044715, %v2757_v10  ;;  %v5290_v22 = vadd.f32 %v2727_v2, %v5248_v7  ;;  %v2692_v23 = vpop.f32.mrf.mxu0 }
 0x904   : > { %v2799_v24 = vmul.f32 0.7978846, %v2783_v13  ;;  %v2788_v26 = vadd.f32 %v2772_v14, %v5266_v53  ;;  %v2739_v29 = vmul.f32 %v5286_v18, %v5286_v18  ;;  %v5296_v5 = vadd.f32 %v2692_v23, %v5226_v27  ;;  %v2711_v30 = vpop.f32.mrf.mxu1 }
 0x905   : > { %v2802_v31 = vmul.f32 0.7978846, %v2786_v19  ;;  %v2789_v32 = vadd.f32 %v2773_v21, %v5272_v61  ;;  %v2742_v36 = vmul.f32 %v5290_v22, %v5290_v22  ;;  %v5302_v38 = vadd.f32 %v2711_v30, %v5228_v28 }
 0x906   : > { %v4501_v59 = vpop.eup %4500  ;;  %4504 = vtanh.f32 %v2799_v24  ;;  %v2804_v34 = vmul.f32 0.7978846, %v2788_v26  ;;  %v2755_v58 = vmul.f32 %v2739_v29, %v5286_v18  ;;  %v2744_v60 = vmul.f32 %v5296_v5, %v5296_v5 }
 0x907   : > { %v4503_v39 = vpop.eup %4502  ;;  %v2832_v40 = vadd.f32 1.0, %v4501_v59  ;;  %4506 = vtanh.f32 %v2802_v31  ;;  %v2805_v41 = vmul.f32 0.7978846, %v2789_v32  ;;  %v2758_v42 = vmul.f32 %v2742_v36, %v5290_v22 }
 0x908   : > { %v2833_v43 = vadd.f32 1.0, %v4503_v39  ;;  %4508 = vtanh.f32 %v2804_v34  ;;  %v2771_v44 = vmul.f32 0.044715, %v2755_v58  ;;  %v2760_v45 = vmul.f32 %v2744_v60, %v5296_v5 }
 0x909   : > { %v2848_v47 = vmul.f32 0.5, %v2832_v40  ;;  %4510 = vtanh.f32 %v2805_v41  ;;  %v2774_v11 = vmul.f32 0.044715, %v2758_v42  ;;  %v2745_v50 = vmul.f32 %v5302_v38, %v5302_v38  ;;  %v2673_v51 = vpop.f32.mrf.mxu3 }
 0x90a   : > { %v2849_v17 = vmul.f32 0.5, %v2833_v43  ;;  %v2787_v55 = vadd.f32 %v2771_v44, %v5286_v18  ;;  %v2776_v56 = vmul.f32 0.044715, %v2760_v45  ;;  %v5313_v57 = vadd.f32 %v2673_v51, %v5244_v35  ;;  %v2730_v62 = vpop.f32.mrf.mxu2 }
 0x90b   : > { %v5316_v63 = vmul.f32 %v2848_v47, %v5235_v33  ;;  %v2790_v15 = vadd.f32 %v2774_v11, %v5290_v22  ;;  %v2761_v0 = vmul.f32 %v2745_v50, %v5302_v38  ;;  %v5321_v20 = vadd.f32 %v2730_v62, %v5248_v7  ;;  %v2694_v25 = vpop.f32.mrf.mxu0 }
 0x90c   : > { %v4505_v1 = vpop.eup %4504  ;;  %v5324_v4 = vmul.f32 %v2849_v17, %v5238_v37  ;;  %v2803_v6 = vmul.f32 0.7978846, %v2787_v55  ;;  %v2792_v8 = vadd.f32 %v2776_v56, %v5296_v5  ;;  %v2743_v9 = vmul.f32 %v5313_v57, %v5313_v57  ;;  %v2713_v23 = vpop.f32.mrf.mxu1 }
 0x90d   : > { %v4507_v33 = vpop.eup %4506  ;;  %v2831_v10 = vadd.f32 1.0, %v4505_v1  ;;  %v2806_v12 = vmul.f32 0.7978846, %v2790_v15  ;;  %v2777_v13 = vmul.f32 0.044715, %v2761_v0  ;;  %v2746_v14 = vmul.f32 %v5321_v20, %v5321_v20 }
 0x90e   : > { %v4509_v2 = vpop.eup %4508  ;;  %v2834_v19 = vadd.f32 1.0, %v4507_v33  ;;  %4512 = vtanh.f32 %v2803_v6  ;;  %v2759_v21 = vmul.f32 %v2743_v9, %v5313_v57  ;;  %v5333_v37 = vadd.f32 %v2694_v25, %v5226_v27 }
 0x90f   : > { %v4511_v24 = vpop.eup %4510  ;;  %v2847_v26 = vmul.f32 0.5, %v2831_v10  ;;  %v2836_v29 = vadd.f32 1.0, %v4509_v2  ;;  %4514 = vtanh.f32 %v2806_v12  ;;  %v2793_v30 = vadd.f32 %v2777_v13, %v5302_v38 }
 0x910   : > { %v2850_v31 = vmul.f32 0.5, %v2834_v19  ;;  %v2837_v32 = vadd.f32 1.0, %v4511_v24  ;;  %v2775_v36 = vmul.f32 0.044715, %v2759_v21  ;;  %v2762_v59 = vmul.f32 %v2746_v14, %v5321_v20 }
 0x911   : > { %v2863_v34 = vmul.f32 %v2847_v26, %v5257_v46  ;;  %v2852_v58 = vmul.f32 0.5, %v2836_v29  ;;  %v2748_v60 = vmul.f32 %v5333_v37, %v5333_v37  ;;  %v5341_v27 = vadd.f32 %v2713_v23, %v5228_v28  ;;  %v2675_v39 = vpop.f32.mrf.mxu3 }
 0x912   : > { %v2866_v40 = vmul.f32 %v2850_v31, %v5260_v49  ;;  %v2853_v41 = vmul.f32 0.5, %v2837_v32  ;;  %v2791_v42 = vadd.f32 %v2775_v36, %v5313_v57  ;;  %v2778_v43 = vmul.f32 0.044715, %v2762_v59  ;;  %v2732_v44 = vpop.f32.mrf.mxu2 }
 0x913   : > { %v2868_v45 = vmul.f32 %v2852_v58, %v5266_v53  ;;  %v2764_v47 = vmul.f32 %v2748_v60, %v5333_v37  ;;  %v2749_v46 = vmul.f32 %v5341_v27, %v5341_v27  ;;  %v5350_v11 = vadd.f32 %v2675_v39, %v5244_v35 }
 0x914   : > { %v4513_v28 = vpop.eup %4512  ;;  %v2869_v50 = vmul.f32 %v2853_v41, %v5272_v61  ;;  %v2807_v51 = vmul.f32 0.7978846, %v2791_v42  ;;  %v2794_v49 = vadd.f32 %v2778_v43, %v5321_v20  ;;  %v5355_v17 = vadd.f32 %v2732_v44, %v5248_v7 }
 0x915   : > { %v4515_v55 = vpop.eup %4514  ;;  %v2835_v56 = vadd.f32 1.0, %v4513_v28  ;;  %v2780_v53 = vmul.f32 0.044715, %v2764_v47  ;;  %v2765_v62 = vmul.f32 %v2749_v46, %v5341_v27  ;;  %v2747_v15 = vmul.f32 %v5350_v11, %v5350_v11 }
 0x916   : > { %v2838_v0 = vadd.f32 1.0, %v4515_v55  ;;  %4516 = vtanh.f32 %v2807_v51  ;;  %v2750_v35 = vmul.f32 %v5355_v17, %v5355_v17  ;;  %v2880_v61 = vpack.c.bf16 %v2868_v45, %v5316_v63 }
 0x917   : > { %v2851_v25 = vmul.f32 0.5, %v2835_v56  ;;  %v2796_v1 = vadd.f32 %v2780_v53, %v5333_v37  ;;  %v2781_v7 = vmul.f32 0.044715, %v2765_v62  ;;  %v2763_v6 = vmul.f32 %v2747_v15, %v5350_v11 }
 0x918   : > { %v2854_v9 = vmul.f32 0.5, %v2838_v0  ;;  %v2766_v33 = vmul.f32 %v2750_v35, %v5355_v17  ;;  %3174 = vmatmul.bf16.vlgmr.msra.gmra.mxu0 %v2880_v61  ;;  %v2881_v10 = vpack.c.bf16 %v2869_v50, %v5324_v4  ;;  %v2808_v12 = vmul.f32 0.7978846, %v2792_v8 }
 0x919   : > { %v2867_v13 = vmul.f32 %v2851_v25, %v5286_v18  ;;  %v2797_v14 = vadd.f32 %v2781_v7, %v5341_v27  ;;  %v2779_v2 = vmul.f32 0.044715, %v2763_v6  ;;  %v2812_v19 = vmul.f32 0.7978846, %v2796_v1 }
 0x91a   : > { %v2870_v63 = vmul.f32 %v2854_v9, %v5290_v22  ;;  %v2782_v21 = vmul.f32 0.044715, %v2766_v33  ;;  %3193 = vmatmul.bf16.vlgmr.msra.gmra.mxu1 %v2881_v10  ;;  %4518 = vtanh.f32 %v2808_v12  ;;  %v2809_v23 = vmul.f32 0.7978846, %v2793_v30 }
 0x91b   : > { %v2795_v24 = vadd.f32 %v2779_v2, %v5350_v11  ;;  %v2879_v26 = vpack.c.bf16 %v2867_v13, %v2863_v34  ;;  %4520 = vtanh.f32 %v2812_v19  ;;  %v2813_v29 = vmul.f32 0.7978846, %v2797_v14 }
 0x91c   : > { %v4517_v31 = vpop.eup %4516  ;;  %v2798_v4 = vadd.f32 %v2782_v21, %v5355_v17  ;;  %v2882_v8 = vpack.c.bf16 %v2870_v63, %v2866_v40  ;;  %4522 = vtanh.f32 %v2809_v23  ;;  %v2810_v18 = vmul.f32 0.7978846, %v2794_v49 }
 0x91d   : > { %v2811_v32 = vmul.f32 0.7978846, %v2795_v24  ;;  %3155 = vmatmul.bf16.vlgmr.msra.gmra.mxu3 %v2879_v26  ;;  %4524 = vtanh.f32 %v2813_v29  ;;  %v2839_v34 = vadd.f32 1.0, %v4517_v31 }
 0x91e   : > { %3212 = vmatmul.bf16.vlgmr.msra.gmra.mxu2 %v2882_v8  ;;  %v2814_v22 = vmul.f32 0.7978846, %v2798_v4  ;;  %4526 = vtanh.f32 %v2810_v18 }
 0x91f   : > { %4528 = vtanh.f32 %v2811_v32  ;;  %v2855_v46 = vmul.f32 0.5, %v2839_v34 }
 0x920   : > { %v4519_v36 = vpop.eup %4518  ;;  %4530 = vtanh.f32 %v2814_v22 }
 0x921   : > { %v4521_v30 = vpop.eup %4520  ;;  %v2840_v59 = vadd.f32 1.0, %v4519_v36  ;;  %v2871_v7 = vmul.f32 %v2855_v46, %v5313_v57 }
 0x922   : > { %v4523_v58 = vpop.eup %4522  ;;  %v2844_v60 = vadd.f32 1.0, %v4521_v30 }
 0x923   : > { %v4525_v39 = vpop.eup %4524  ;;  %v2856_v41 = vmul.f32 0.5, %v2840_v59  ;;  %v2841_v42 = vadd.f32 1.0, %v4523_v58 }
 0x924   : > { %v4527_v40 = vpop.eup %4526  ;;  %v2860_v43 = vmul.f32 0.5, %v2844_v60  ;;  %v2845_v44 = vadd.f32 1.0, %v4525_v39 }
 0x925   : > { %v4529_v45 = vpop.eup %4528  ;;  %v2857_v47 = vmul.f32 0.5, %v2841_v42  ;;  %v2842_v28 = vadd.f32 1.0, %v4527_v40  ;;  %v2872_v51 = vmul.f32 %v2856_v41, %v5296_v5 }
 0x926   : > { %v4531_v50 = vpop.eup %4530  ;;  %v2876_v49 = vmul.f32 %v2860_v43, %v5333_v37  ;;  %v2861_v55 = vmul.f32 0.5, %v2845_v44  ;;  %v2843_v56 = vadd.f32 1.0, %v4529_v45 }
 0x927   : > { %v2846_v53 = vadd.f32 1.0, %v4531_v50  ;;  %v2858_v62 = vmul.f32 0.5, %v2842_v28  ;;  %v2873_v0 = vmul.f32 %v2857_v47, %v5302_v38 }
 0x928   : > { %v2884_v15 = vpack.c.bf16 %v2876_v49, %v2872_v51  ;;  %v2877_v35 = vmul.f32 %v2861_v55, %v5341_v27  ;;  %v2859_v61 = vmul.f32 0.5, %v2843_v56  ;;  %v4449_v27 = vld [vmem:[%s962_s25] ss:$0 sm:$0xff] }
 0x929   : > { %v2862_v25 = vmul.f32 0.5, %v2846_v53  ;;  %v2874_v37 = vmul.f32 %v2858_v62, %v5321_v20 }
 0x92a   : > { %3179 = vmatmul.bf16.gmra.mxu0 %v2884_v15  ;;  %v2885_v1 = vpack.c.bf16 %v2877_v35, %v2873_v0  ;;  %v2875_v5 = vmul.f32 %v2859_v61, %v5350_v11 }
 0x92b   : > { %v2878_v6 = vmul.f32 %v2862_v25, %v5355_v17 }
 0x92c   : > { %3198 = vmatmul.bf16.gmra.mxu1 %v2885_v1  ;;  %v2883_v9 = vpack.c.bf16 %v2875_v5, %v2871_v7 }
 0x92d   : > { %v2886_v33 = vpack.c.bf16 %v2878_v6, %v2874_v37 }
 0x92e   : > { %3160 = vmatmul.bf16.gmra.mxu3 %v2883_v9 }
 0x92f   : > { %3217 = vmatmul.bf16.gmra.mxu2 %v2886_v33 }
 0x995   : > { %v3175_v38 = vpop.f32.mrf.mxu0 }
 0x997   : > { %v3194_v10 = vpop.f32.mrf.mxu1 }
 0x99d   : > { %v3177_v20 = vpop.f32.mrf.mxu0 }
 0x99f   : > { %v3196_v19 = vpop.f32.mrf.mxu1 }
 0x9a0   : > { %v3156_v12 = vpop.f32.mrf.mxu3 }
 0x9a1   : > { %v3157_v57 = vadd.f32 %v4449_v27, %v3156_v12  ;;  %v3213_v13 = vpop.f32.mrf.mxu2 }
 0x9a3   : > { %v3176_v11 = vadd.f32 %v3175_v38, %v3157_v57 }
 0x9a5   : > { %v3195_v14 = vadd.f32 %v3194_v10, %v3176_v11 }
 0x9a7   : > { %v3214_v2 = vadd.f32 %v3213_v13, %v3195_v14  ;;  %v3180_v31 = vpop.f32.mrf.mxu0 }
 0x9a8   : > { %v3158_v17 = vpop.f32.mrf.mxu3 }
 0x9a9   : > { %v3223_v63 = vadd.f32 %v3214_v2, %v5087_v48  ;;  %v3159_v21 = vadd.f32 %v4449_v27, %v3158_v17  ;;  %v3215_v24 = vpop.f32.mrf.mxu2  ;;  %v3199_v32 = vpop.f32.mrf.mxu1 }
 0x9ab   : > { %3227 = vst [vmem:[#allocation2 + $0x10] sm:$0xff] %v3223_v63  ;;  %v3178_v23 = vadd.f32 %v3177_v20, %v3159_v21 }
 0x9ad   : > { %v3197_v26 = vadd.f32 %v3196_v19, %v3178_v23 }
 0x9af   : > { %v3216_v29 = vadd.f32 %v3215_v24, %v3197_v26  ;;  %v3182_v60 = vpop.f32.mrf.mxu0 }
 0x9b1   : > { %v3224_v4 = vadd.f32 %v3216_v29, %v5090_v52  ;;  %v3161_v8 = vpop.f32.mrf.mxu3  ;;  %v3201_v41 = vpop.f32.mrf.mxu1 }
 0x9b2   : > { %v3162_v18 = vadd.f32 %v4449_v27, %v3161_v8  ;;  %v3218_v36 = vpop.f32.mrf.mxu2 }
 0x9b3   : > { %3228 = vst [vmem:[#allocation2] sm:$0xff] %v3224_v4 }
 0x9b4   : > { %v3181_v22 = vadd.f32 %v3180_v31, %v3162_v18 }
 0x9b6   : > { %v3200_v30 = vadd.f32 %v3199_v32, %v3181_v22 }
 0x9b8   : > { %v3219_v59 = vadd.f32 %v3218_v36, %v3200_v30 }
 0x9b9   : > { %v3163_v34 = vpop.f32.mrf.mxu3 }
 0x9ba   : > { %v3225_v48 = vadd.f32 %v3219_v59, %v5093_v16  ;;  %v3164_v58 = vadd.f32 %v4449_v27, %v3163_v34  ;;  %v3220_v40 = vpop.f32.mrf.mxu2 }
 0x9bc   : > { %3229 = vst [vmem:[#allocation2 + $0x18] sm:$0xff] %v3225_v48  ;;  %v3183_v39 = vadd.f32 %v3182_v60, %v3164_v58 }
 0x9be   : > { %v3202_v42 = vadd.f32 %v3201_v41, %v3183_v39 }
 0x9c0   : > { %v3221_v43 = vadd.f32 %v3220_v40, %v3202_v42  ;;  %3234 = sbr.rel (%p4243_p8) target bundleno = 2777 (0xad9), region = 112 }
 0x9c2   : > { %v3226_v52 = vadd.f32 %v3221_v43, %v5096_v3 }
 0x9c4   : > { %3230 = vst [vmem:[#allocation2 + $0x8] sm:$0xff] %v3226_v52 }
 0x9c5   : > { %3241 = vadd.xlane.f32.xlu1 %v3225_v48  ;;  %3237 = vadd.xlane.f32.xlu0 %v3223_v63  ;;  %v4536_v24 = vld [vmem:[%s5528_s5] ss:$0 sm:$0xff] }
 0x9c6   : > { %v4537_v18 = vld [vmem:[%s5529_s30] ss:$0 sm:$0xff] }
 0x9cd   : > { %3243 = vadd.xlane.f32.xlu1 %v3226_v52  ;;  %3239 = vadd.xlane.f32.xlu0 %v3224_v4 }
 0xa38   : > { %v3242_v44 = vpop.xlane.xlu1 %3241  ;;  %v3238_v16 = vpop.xlane.xlu0 %3237 }
 0xa39   : > { %v3247_v45 = vmul.f32 %v3242_v44, %v4878_v54  ;;  %v3245_v47 = vmul.f32 %v3238_v16, %v4878_v54 }
 0xa3b   : > { %v5392_v46 = vsub.f32 %v3225_v48, %v3247_v45  ;;  %v3249_v28 = vsub.f32 %v3223_v63, %v3245_v47 }
 0xa3d   : > { %v3255_v3 = vmul.f32 %v5392_v46, %v5392_v46  ;;  %v3253_v50 = vmul.f32 %v3249_v28, %v3249_v28 }
 0xa3f   : > { %3261 = vadd.xlane.f32.xlu0 %v3255_v3  ;;  %3257 = vadd.xlane.f32.xlu2 %v3253_v50 }
 0xa40   : > { %v3244_v51 = vpop.xlane.xlu1 %3243  ;;  %v3240_v49 = vpop.xlane.xlu0 %3239 }
 0xa41   : > { %v3248_v55 = vmul.f32 %v3244_v51, %v4878_v54  ;;  %v3246_v56 = vmul.f32 %v3240_v49, %v4878_v54 }
 0xa43   : > { %v5398_v53 = vsub.f32 %v3226_v52, %v3248_v55  ;;  %v5400_v62 = vsub.f32 %v3224_v4, %v3246_v56 }
 0xa45   : > { %v3256_v15 = vmul.f32 %v5398_v53, %v5398_v53  ;;  %v3254_v0 = vmul.f32 %v5400_v62, %v5400_v62 }
 0xa47   : > { %3263 = vadd.xlane.f32.xlu1 %v3256_v15  ;;  %3259 = vadd.xlane.f32.xlu2 %v3254_v0 }
 0xab2   : > { %v3258_v35 = vpop.xlane.xlu2 %3257  ;;  %v3262_v61 = vpop.xlane.xlu0 %3261 }
 0xab3   : > { %v3265_v25 = vmul.f32 %v3258_v35, %v4878_v54  ;;  %v3267_v1 = vmul.f32 %v3262_v61, %v4878_v54 }
 0xab5   : > { %v3269_v7 = vadd.f32 1e-06, %v3265_v25  ;;  %v3271_v5 = vadd.f32 1e-06, %v3267_v1 }
 0xab7   : > { %4538 = vrsqrt.f32 %v3269_v7  ;;  %vm3279_vm15 = vweird.f32 %v3269_v7  ;;  %vm3299_vm2 = vweird.f32 %v3271_v5 }
 0xab8   : > { %4540 = vrsqrt.f32 %v3271_v5 }
 0xaba   : > { %v3264_v37 = vpop.xlane.xlu1 %3263  ;;  %v3260_v6 = vpop.xlane.xlu2 %3259 }
 0xabb   : > { %v3268_v9 = vmul.f32 %v3264_v37, %v4878_v54  ;;  %v3266_v33 = vmul.f32 %v3260_v6, %v4878_v54 }
 0xabd   : > { %v4539_v38 = vpop.eup %4538  ;;  %v3272_v27 = vadd.f32 1e-06, %v3268_v9  ;;  %v3270_v10 = vadd.f32 1e-06, %v3266_v33 }
 0xabe   : > { %v4541_v12 = vpop.eup %4540  ;;  %v3274_v57 = vmul.f32 %v4539_v38, %v3269_v7  ;;  %vm3280_vm14 = vweird.f32 %v4539_v38 }
 0xabf   : > { %v3294_v13 = vmul.f32 %v4541_v12, %v3271_v5  ;;  %4542 = vrsqrt.f32 %v3272_v27  ;;  %vm3281_vm0 = vmor %vm3279_vm15, %vm3280_vm14  ;;  %vm3300_vm1 = vweird.f32 %v4541_v12  ;;  %vm3309_vm6 = vweird.f32 %v3272_v27 }
 0xac0   : > { %v3275_v11 = vmul.f32 %v4539_v38, %v3274_v57  ;;  %4544 = vrsqrt.f32 %v3270_v10  ;;  %vm3301_vm3 = vmor %vm3299_vm2, %vm3300_vm1  ;;  %vm3289_vm8 = vweird.f32 %v3270_v10 }
 0xac1   : > { %v3295_v14 = vmul.f32 %v4541_v12, %v3294_v13 }
 0xac2   : > { %v3276_v20 = vmul.f32 0.5, %v3275_v11 }
 0xac3   : > { %v3296_v2 = vmul.f32 0.5, %v3295_v14 }
 0xac4   : > { %v3277_v17 = vsub.f32 1.5, %v3276_v20 }
 0xac5   : > { %v4543_v19 = vpop.eup %4542  ;;  %v3297_v63 = vsub.f32 1.5, %v3296_v2 }
 0xac6   : > { %v4545_v21 = vpop.eup %4544  ;;  %v3278_v23 = vmul.f32 %v4539_v38, %v3277_v17  ;;  %v3304_v54 = vmul.f32 %v4543_v19, %v3272_v27  ;;  %vm3310_vm4 = vweird.f32 %v4543_v19 }
 0xac7   : > { %v3284_v26 = vmul.f32 %v4545_v21, %v3270_v10  ;;  %v3298_v31 = vmul.f32 %v4541_v12, %v3297_v63  ;;  %vm3290_vm5 = vweird.f32 %v4545_v21  ;;  %vm3311_vm7 = vmor %vm3309_vm6, %vm3310_vm4 }
 0xac8   : > { %v3282_v29 = vsel %vm3281_vm0, %v4539_v38, %v3278_v23  ;;  %v3305_v4 = vmul.f32 %v4543_v19, %v3304_v54  ;;  %vm3291_vm9 = vmor %vm3289_vm8, %vm3290_vm5 }
 0xac9   : > { %v3313_v8 = vmul.f32 %v3282_v29, %v3249_v28  ;;  %v3285_v32 = vmul.f32 %v4545_v21, %v3284_v26  ;;  %v3302_v59 = vsel %vm3301_vm3, %v4541_v12, %v3298_v31 }
 0xaca   : > { %v3306_v22 = vmul.f32 0.5, %v3305_v4  ;;  %v3315_v39 = vmul.f32 %v3302_v59, %v5392_v46 }
 0xacb   : > { %v3320_v36 = vmul.f32 %v4536_v24, %v3313_v8  ;;  %v3286_v30 = vmul.f32 0.5, %v3285_v32 }
 0xacc   : > { %v3307_v34 = vsub.f32 1.5, %v3306_v22  ;;  %v3322_v44 = vmul.f32 %v4536_v24, %v3315_v39 }
 0xacd   : > { %v3327_v48 = vadd.f32 %v4537_v18, %v3320_v36  ;;  %v3287_v58 = vsub.f32 1.5, %v3286_v30 }
 0xace   : > { %v3308_v60 = vmul.f32 %v4543_v19, %v3307_v34  ;;  %v3329_v28 = vadd.f32 %v4537_v18, %v3322_v44 }
 0xacf   : > { %3331 = vst [vmem:[%s4825_s6] sm:$0xff] %v3327_v48  ;;  %v3288_v41 = vmul.f32 %v4545_v21, %v3287_v58 }
 0xad0   : > { %v3312_v42 = vsel %vm3311_vm7, %v4543_v19, %v3308_v60  ;;  %3333 = vst [vmem:[%s4825_s6 + $0x10] sm:$0xff] %v3329_v28 }
 0xad1   : > { %v3316_v40 = vmul.f32 %v3312_v42, %v5398_v53  ;;  %v3292_v43 = vsel %vm3291_vm9, %v4545_v21, %v3288_v41 }
 0xad2   : > { %v3314_v52 = vmul.f32 %v3292_v43, %v5400_v62 }
 0xad3   : > { %v3323_v16 = vmul.f32 %v4536_v24, %v3316_v40 }
 0xad4   : > { %v3321_v45 = vmul.f32 %v4536_v24, %v3314_v52 }
 0xad5   : > { %v3330_v3 = vadd.f32 %v4537_v18, %v3323_v16 }
 0xad6   : > { %v3328_v47 = vadd.f32 %v4537_v18, %v3321_v45 }
 0xad7   : > { %3334 = vst [vmem:[%s4825_s6 + $0x18] sm:$0xff] %v3330_v3 }
 0xad8   : > { %3332 = vst [vmem:[%s4825_s6 + $0x8] sm:$0xff] %v3328_v47 }
 0xad9 PF: > { %s5530_s9 = sld [smem:[#allocation6_spill]] }
 0xada   : > { %s5531_s2 = sld [smem:[#allocation4_spill]] }
 0xadb   : > { %s5532_s25 = sld [smem:[#allocation5_spill]] }
 0xadc   : > { %s5533_s26 = sld [smem:[#allocation7_spill]] }
 0xadd   : > { %s5534_s27 = sld [smem:[#allocation8_spill]] }
 0xadf   : > { %s31_s3 = sadd.s32 1, %s5530_s9  }
 0xae0   : > { %p28_p9 = scmp.ge.s32.totalorder %s31_s3, 6  }
 0xae2   :  { %30 = sbr.rel (!%p28_p9) target bundleno = 20 (0x14), region = 200 }

</bundles_post_ra>
